<compile_context>
chip_gen: v7x
topology: tpu7x:2x2x1
jax: 0.10.0
libtpu: 0.0.40
codegen_flags: <defaults>
</compile_context>

<pallas_src>
import jax
import jax.numpy as jnp
from jax.experimental import pallas as pl
from jax.experimental.pallas import tpu as pltpu

RADIUS = 4                # static truncation radius
KSIZE = 2 * RADIUS + 1    # 9-tap separable kernel


def _blur_kernel(w_ref, x_ref, o_ref):
    """Separable 9-tap Gaussian blur with replicate ("edge") padding.

    Block layout (Pb, H, W): W in lanes, H in sublanes, planes leading.
    Both passes are roll + mask on values (no scratch, no padded round trip).

    w_ref : SMEM (KSIZE,) f32   -- normalized 1D Gaussian taps
    x_ref : VMEM (Pb, H, W)     -- input block (kept in input dtype)
    o_ref : VMEM (Pb, H, W)     -- output block
    """
    Pb, H, W = x_ref.shape
    x = x_ref[...].astype(jnp.float32)
    # TODO(synk): on v6e/v7x a bf16 compute path would halve vreg/VMEM traffic
    # for bf16 inputs; kept f32 so the same kernel is exact on v5e as well.

    w_c = w_ref[RADIUS]  # center tap; w[R+s] == w[R-s] by symmetry

    # ---- Vertical (H / sublane) pass ----------------------------------------
    row = jax.lax.broadcasted_iota(jnp.int32, (1, H, W), dimension=1)
    top = x[:, 0:1, :]          # (Pb, 1, W) -- broadcast inside jnp.where
    bot = x[:, H - 1:H, :]
    tmp = w_c * x
    for s in range(1, RADIUS + 1):            # symmetric pairs: 4 muls + center
        plus = pltpu.roll(x, shift=H - s, axis=1)     # row h -> x[h + s]
        plus = jnp.where(row < H - s, plus, bot)      # clamp to bottom edge
        minus = pltpu.roll(x, shift=s, axis=1)        # row h -> x[h - s]
        minus = jnp.where(row >= s, minus, top)       # clamp to top edge
        tmp = tmp + w_ref[RADIUS + s] * (plus + minus)

    # ---- Horizontal (W / lane) pass ------------------------------------------
    col = jax.lax.broadcasted_iota(jnp.int32, (1, H, W), dimension=2)
    left = tmp[:, :, 0:1]       # (Pb, H, 1)
    right = tmp[:, :, W - 1:W]
    acc = w_c * tmp
    for s in range(1, RADIUS + 1):
        plus = pltpu.roll(tmp, shift=W - s, axis=2)   # col j -> tmp[j + s]
        plus = jnp.where(col < W - s, plus, right)    # clamp to right edge
        minus = pltpu.roll(tmp, shift=s, axis=2)      # col j -> tmp[j - s]
        minus = jnp.where(col >= s, minus, left)      # clamp to left edge
        acc = acc + w_ref[RADIUS + s] * (plus + minus)

    o_ref[...] = acc.astype(o_ref.dtype)


def _vmem_budget_bytes():
    """Generation-aware scoped-VMEM limit (v7x: 64 MiB physical, v5e/v6e: 128)."""
    cap = 64 * 1024 * 1024
    try:
        cap = int(getattr(pltpu.get_tpu_info(), "vmem_capacity_bytes", cap))
    except Exception:
        pass                                   # be conservative if query fails
    return min((cap * 3) // 4, 96 * 1024 * 1024)


def _choose_plane_block(P, H, W, itemsize, vmem_limit):
    """Planes per grid step (Pb).  Must divide P.  Sized so that the live VMEM
    (2x double-buffered input block + 2x output block + ~6 block-sized f32
    temporaries) stays under ~half the scoped limit, the input block stays in
    the 2-8 MiB HBM-roofline sweet spot, and the grid keeps >= 2 steps whenever
    P >= 2 (so v7x can shard the "parallel" axis across both TensorCores)."""
    # TODO(synk): for extreme H*W where even Pb=1 blows the budget, add an
    # H-tiled grid axis with a 2*RADIUS row halo instead of full-H blocks.
    plane = H * W
    per_plane_live = plane * (4 * itemsize + 6 * 4)
    cap_vmem = max(1, (vmem_limit // 2) // per_plane_live)
    cap_sweet = max(1, (8 * 1024 * 1024) // (plane * itemsize))
    cap = min(cap_vmem, cap_sweet, P)
    if P >= 2:
        cap = min(cap, max(1, P // 2))
    for d in range(cap, 0, -1):
        if P % d == 0:
            return d
    return 1


def gaussian_blur_planes(planes, weights):
    """planes: (P, H, W) in the input dtype; weights: (KSIZE,) f32."""
    P, H, W = planes.shape
    vmem_limit = _vmem_budget_bytes()
    Pb = _choose_plane_block(P, H, W, planes.dtype.itemsize, vmem_limit)

    return pl.pallas_call(
        _blur_kernel,
        out_shape=jax.ShapeDtypeStruct((P, H, W), planes.dtype),
        grid=(P // Pb,),
        in_specs=[
            pl.BlockSpec(memory_space=pltpu.SMEM),           # Gaussian taps
            pl.BlockSpec((Pb, H, W), lambda i: (i, 0, 0)),   # plane block
        ],
        out_specs=pl.BlockSpec((Pb, H, W), lambda i: (i, 0, 0)),
        compiler_params=pltpu.CompilerParams(
            dimension_semantics=("parallel",),   # planes are independent
            vmem_limit_bytes=int(vmem_limit)),
    )(weights, planes)


def _gaussian_taps(sigma):
    offs = jnp.arange(-RADIUS, RADIUS + 1, dtype=jnp.float32)
    w = jnp.exp(-0.5 * (offs / sigma) ** 2)
    return (w / jnp.sum(w)).astype(jnp.float32)


def _gaussian_blur_impl(img, p, key):
    """Forward pass of GaussianBlur(p) for an NCHW image batch.

    img : (N, C, H, W), any float dtype (kept through the DMA)
    p   : Python float, probability of applying the blur
    key : jax PRNG key (replaces Python `random` for determinism)
    """
    N, C, H, W = img.shape
    assert H > RADIUS and W > RADIUS
    k_coin, k_sigma = jax.random.split(key)

    u = jax.random.uniform(k_coin)                    # random.random()
    sigma = jax.random.uniform(k_sigma) * 1.9 + 0.1   # random.random()*1.9+0.1
    w = _gaussian_taps(sigma)

    def blur_branch(operands):
        im, taps = operands
        planes = im.reshape(N * C, H, W)      # metadata-only, no HBM round trip
        out = gaussian_blur_planes(planes, taps)
        return out.reshape(N, C, H, W)

    def identity_branch(operands):
        im, _ = operands
        return im

    # lax.cond: the blur work is skipped entirely when the coin misses.
    return jax.lax.cond(u < p, blur_branch, identity_branch, (img, w))


gaussian_blur = jax.jit(_gaussian_blur_impl, static_argnames=("p",))


if __name__ == "__main__":
    key = jax.random.PRNGKey(0)
    k_img, k_fwd = jax.random.split(key)

    N, C, H, W = 2, 4, 16, 16
    img = jax.random.uniform(k_img, (N, C, H, W), dtype=jnp.float32)

    # Module semantics: blur with probability p, else identity.
    out = jax.block_until_ready(gaussian_blur(img, p=0.5, key=k_fwd))
    assert out.shape == img.shape and out.dtype == img.dtype
    assert bool(jnp.all(jnp.isfinite(out)))

    # Force the blur branch (p=1.0 => coin always hits) so the Pallas kernel
    # definitely executes; blurring a constant image must be (near) identity,
    # which also validates the in-kernel replicate-edge handling.
    ones = jnp.ones((N, C, H, W), jnp.float32)
    out_ones = jax.block_until_ready(gaussian_blur(ones, p=1.0, key=k_fwd))
    assert bool(jnp.all(jnp.abs(out_ones - 1.0) < 1e-5))

    out_blur = jax.block_until_ready(gaussian_blur(img, p=1.0, key=k_fwd))
    assert out_blur.shape == img.shape and out_blur.dtype == img.dtype
    assert bool(jnp.all(jnp.isfinite(out_blur)))

    print("KERNEL_OK")
</pallas_src>

<mosaic_0001>
module attributes {stable_mosaic.version = 11 : i64} {
  func.func @_blur_kernel(%arg0: i32, %arg1: memref<9xf32, #tpu.memory_space<smem>>, %arg2: memref<4x16x16xf32, #tpu.memory_space<vmem>>, %arg3: memref<4x16x16xf32, #tpu.memory_space<vmem>>) attributes {dimension_semantics = [#tpu.dimension_semantics<parallel>], iteration_bounds = array<i64: 2>, scalar_prefetch = 0 : i64, scratch_operands = 0 : i64, tpu.core_type = #tpu.core_type<tc>, window_params = [{transform_indices = @transform_0, window_bounds = array<i64: 9>}, {transform_indices = @transform_1, window_bounds = array<i64: 4, 16, 16>}, {transform_indices = @transform_2, window_bounds = array<i64: 4, 16, 16>}]} {
    %c0 = arith.constant 0 : index
    %c0_0 = arith.constant 0 : index
    %c0_1 = arith.constant 0 : index
    %0 = vector.load %arg2[%c0, %c0_0, %c0_1] : memref<4x16x16xf32, #tpu.memory_space<vmem>>, vector<4x16x16xf32>
    %c4 = arith.constant 4 : index
    %1 = memref.load %arg1[%c4] : memref<9xf32, #tpu.memory_space<smem>>
    %2 = tpu.iota {dimensions = array<i32: 1>} : vector<1x16x16xi32>
    %3 = vector.extract_strided_slice %0 {offsets = [0, 0, 0], sizes = [4, 1, 16], strides = [1, 1, 1]} : vector<4x16x16xf32> to vector<4x1x16xf32>
    %4 = vector.extract_strided_slice %0 {offsets = [0, 15, 0], sizes = [4, 1, 16], strides = [1, 1, 1]} : vector<4x16x16xf32> to vector<4x1x16xf32>
    %5 = vector.broadcast %1 : f32 to vector<4x16x16xf32>
    %6 = arith.mulf %5, %0 : vector<4x16x16xf32>
    %c15_i32 = arith.constant 15 : i32
    %7 = tpu.dynamic_rotate %0 by %c15_i32 dim 1 : vector<4x16x16xf32>, i32 -> vector<4x16x16xf32>
    %c15_i32_2 = arith.constant 15 : i32
    %8 = vector.broadcast %c15_i32_2 : i32 to vector<1x16x16xi32>
    %9 = arith.cmpi slt, %2, %8 : vector<1x16x16xi32>
    %10 = vector.shape_cast %9 : vector<1x16x16xi1> to vector<1x16x16xi1>
    %11 = vector.broadcast %10 : vector<1x16x16xi1> to vector<4x16x16xi1>
    %12 = vector.shape_cast %4 : vector<4x1x16xf32> to vector<4x1x16xf32>
    %13 = vector.broadcast %12 : vector<4x1x16xf32> to vector<4x16x16xf32>
    %14 = arith.select %11, %7, %13 : vector<4x16x16xi1>, vector<4x16x16xf32>
    %c1_i32 = arith.constant 1 : i32
    %15 = tpu.dynamic_rotate %0 by %c1_i32 dim 1 : vector<4x16x16xf32>, i32 -> vector<4x16x16xf32>
    %c1_i32_3 = arith.constant 1 : i32
    %16 = vector.broadcast %c1_i32_3 : i32 to vector<1x16x16xi32>
    %17 = arith.cmpi sge, %2, %16 : vector<1x16x16xi32>
    %18 = vector.shape_cast %17 : vector<1x16x16xi1> to vector<1x16x16xi1>
    %19 = vector.broadcast %18 : vector<1x16x16xi1> to vector<4x16x16xi1>
    %20 = vector.shape_cast %3 : vector<4x1x16xf32> to vector<4x1x16xf32>
    %21 = vector.broadcast %20 : vector<4x1x16xf32> to vector<4x16x16xf32>
    %22 = arith.select %19, %15, %21 : vector<4x16x16xi1>, vector<4x16x16xf32>
    %c5 = arith.constant 5 : index
    %23 = memref.load %arg1[%c5] : memref<9xf32, #tpu.memory_space<smem>>
    %24 = arith.addf %14, %22 : vector<4x16x16xf32>
    %25 = vector.broadcast %23 : f32 to vector<4x16x16xf32>
    %26 = arith.mulf %25, %24 : vector<4x16x16xf32>
    %27 = arith.addf %6, %26 : vector<4x16x16xf32>
    %c14_i32 = arith.constant 14 : i32
    %28 = tpu.dynamic_rotate %0 by %c14_i32 dim 1 : vector<4x16x16xf32>, i32 -> vector<4x16x16xf32>
    %c14_i32_4 = arith.constant 14 : i32
    %29 = vector.broadcast %c14_i32_4 : i32 to vector<1x16x16xi32>
    %30 = arith.cmpi slt, %2, %29 : vector<1x16x16xi32>
    %31 = vector.shape_cast %30 : vector<1x16x16xi1> to vector<1x16x16xi1>
    %32 = vector.broadcast %31 : vector<1x16x16xi1> to vector<4x16x16xi1>
    %33 = vector.shape_cast %4 : vector<4x1x16xf32> to vector<4x1x16xf32>
    %34 = vector.broadcast %33 : vector<4x1x16xf32> to vector<4x16x16xf32>
    %35 = arith.select %32, %28, %34 : vector<4x16x16xi1>, vector<4x16x16xf32>
    %c2_i32 = arith.constant 2 : i32
    %36 = tpu.dynamic_rotate %0 by %c2_i32 dim 1 : vector<4x16x16xf32>, i32 -> vector<4x16x16xf32>
    %c2_i32_5 = arith.constant 2 : i32
    %37 = vector.broadcast %c2_i32_5 : i32 to vector<1x16x16xi32>
    %38 = arith.cmpi sge, %2, %37 : vector<1x16x16xi32>
    %39 = vector.shape_cast %38 : vector<1x16x16xi1> to vector<1x16x16xi1>
    %40 = vector.broadcast %39 : vector<1x16x16xi1> to vector<4x16x16xi1>
    %41 = vector.shape_cast %3 : vector<4x1x16xf32> to vector<4x1x16xf32>
    %42 = vector.broadcast %41 : vector<4x1x16xf32> to vector<4x16x16xf32>
    %43 = arith.select %40, %36, %42 : vector<4x16x16xi1>, vector<4x16x16xf32>
    %c6 = arith.constant 6 : index
    %44 = memref.load %arg1[%c6] : memref<9xf32, #tpu.memory_space<smem>>
    %45 = arith.addf %35, %43 : vector<4x16x16xf32>
    %46 = vector.broadcast %44 : f32 to vector<4x16x16xf32>
    %47 = arith.mulf %46, %45 : vector<4x16x16xf32>
    %48 = arith.addf %27, %47 : vector<4x16x16xf32>
    %c13_i32 = arith.constant 13 : i32
    %49 = tpu.dynamic_rotate %0 by %c13_i32 dim 1 : vector<4x16x16xf32>, i32 -> vector<4x16x16xf32>
    %c13_i32_6 = arith.constant 13 : i32
    %50 = vector.broadcast %c13_i32_6 : i32 to vector<1x16x16xi32>
    %51 = arith.cmpi slt, %2, %50 : vector<1x16x16xi32>
    %52 = vector.shape_cast %51 : vector<1x16x16xi1> to vector<1x16x16xi1>
    %53 = vector.broadcast %52 : vector<1x16x16xi1> to vector<4x16x16xi1>
    %54 = vector.shape_cast %4 : vector<4x1x16xf32> to vector<4x1x16xf32>
    %55 = vector.broadcast %54 : vector<4x1x16xf32> to vector<4x16x16xf32>
    %56 = arith.select %53, %49, %55 : vector<4x16x16xi1>, vector<4x16x16xf32>
    %c3_i32 = arith.constant 3 : i32
    %57 = tpu.dynamic_rotate %0 by %c3_i32 dim 1 : vector<4x16x16xf32>, i32 -> vector<4x16x16xf32>
    %c3_i32_7 = arith.constant 3 : i32
    %58 = vector.broadcast %c3_i32_7 : i32 to vector<1x16x16xi32>
    %59 = arith.cmpi sge, %2, %58 : vector<1x16x16xi32>
    %60 = vector.shape_cast %59 : vector<1x16x16xi1> to vector<1x16x16xi1>
    %61 = vector.broadcast %60 : vector<1x16x16xi1> to vector<4x16x16xi1>
    %62 = vector.shape_cast %3 : vector<4x1x16xf32> to vector<4x1x16xf32>
    %63 = vector.broadcast %62 : vector<4x1x16xf32> to vector<4x16x16xf32>
    %64 = arith.select %61, %57, %63 : vector<4x16x16xi1>, vector<4x16x16xf32>
    %c7 = arith.constant 7 : index
    %65 = memref.load %arg1[%c7] : memref<9xf32, #tpu.memory_space<smem>>
    %66 = arith.addf %56, %64 : vector<4x16x16xf32>
    %67 = vector.broadcast %65 : f32 to vector<4x16x16xf32>
    %68 = arith.mulf %67, %66 : vector<4x16x16xf32>
    %69 = arith.addf %48, %68 : vector<4x16x16xf32>
    %c12_i32 = arith.constant 12 : i32
    %70 = tpu.dynamic_rotate %0 by %c12_i32 dim 1 : vector<4x16x16xf32>, i32 -> vector<4x16x16xf32>
    %c12_i32_8 = arith.constant 12 : i32
    %71 = vector.broadcast %c12_i32_8 : i32 to vector<1x16x16xi32>
    %72 = arith.cmpi slt, %2, %71 : vector<1x16x16xi32>
    %73 = vector.shape_cast %72 : vector<1x16x16xi1> to vector<1x16x16xi1>
    %74 = vector.broadcast %73 : vector<1x16x16xi1> to vector<4x16x16xi1>
    %75 = vector.shape_cast %4 : vector<4x1x16xf32> to vector<4x1x16xf32>
    %76 = vector.broadcast %75 : vector<4x1x16xf32> to vector<4x16x16xf32>
    %77 = arith.select %74, %70, %76 : vector<4x16x16xi1>, vector<4x16x16xf32>
    %c4_i32 = arith.constant 4 : i32
    %78 = tpu.dynamic_rotate %0 by %c4_i32 dim 1 : vector<4x16x16xf32>, i32 -> vector<4x16x16xf32>
    %c4_i32_9 = arith.constant 4 : i32
    %79 = vector.broadcast %c4_i32_9 : i32 to vector<1x16x16xi32>
    %80 = arith.cmpi sge, %2, %79 : vector<1x16x16xi32>
    %81 = vector.shape_cast %80 : vector<1x16x16xi1> to vector<1x16x16xi1>
    %82 = vector.broadcast %81 : vector<1x16x16xi1> to vector<4x16x16xi1>
    %83 = vector.shape_cast %3 : vector<4x1x16xf32> to vector<4x1x16xf32>
    %84 = vector.broadcast %83 : vector<4x1x16xf32> to vector<4x16x16xf32>
    %85 = arith.select %82, %78, %84 : vector<4x16x16xi1>, vector<4x16x16xf32>
    %c8 = arith.constant 8 : index
    %86 = memref.load %arg1[%c8] : memref<9xf32, #tpu.memory_space<smem>>
    %87 = arith.addf %77, %85 : vector<4x16x16xf32>
    %88 = vector.broadcast %86 : f32 to vector<4x16x16xf32>
    %89 = arith.mulf %88, %87 : vector<4x16x16xf32>
    %90 = arith.addf %69, %89 : vector<4x16x16xf32>
    %91 = tpu.iota {dimensions = array<i32: 2>} : vector<1x16x16xi32>
    %92 = vector.extract_strided_slice %90 {offsets = [0, 0, 0], sizes = [4, 16, 1], strides = [1, 1, 1]} : vector<4x16x16xf32> to vector<4x16x1xf32>
    %93 = vector.extract_strided_slice %90 {offsets = [0, 0, 15], sizes = [4, 16, 1], strides = [1, 1, 1]} : vector<4x16x16xf32> to vector<4x16x1xf32>
    %94 = vector.broadcast %1 : f32 to vector<4x16x16xf32>
    %95 = arith.mulf %94, %90 : vector<4x16x16xf32>
    %c15_i32_10 = arith.constant 15 : i32
    %96 = tpu.dynamic_rotate %90 by %c15_i32_10 dim 2 : vector<4x16x16xf32>, i32 -> vector<4x16x16xf32>
    %c15_i32_11 = arith.constant 15 : i32
    %97 = vector.broadcast %c15_i32_11 : i32 to vector<1x16x16xi32>
    %98 = arith.cmpi slt, %91, %97 : vector<1x16x16xi32>
    %99 = vector.shape_cast %98 : vector<1x16x16xi1> to vector<1x16x16xi1>
    %100 = vector.broadcast %99 : vector<1x16x16xi1> to vector<4x16x16xi1>
    %101 = vector.shape_cast %93 : vector<4x16x1xf32> to vector<4x16x1xf32>
    %102 = vector.broadcast %101 : vector<4x16x1xf32> to vector<4x16x16xf32>
    %103 = arith.select %100, %96, %102 : vector<4x16x16xi1>, vector<4x16x16xf32>
    %c1_i32_12 = arith.constant 1 : i32
    %104 = tpu.dynamic_rotate %90 by %c1_i32_12 dim 2 : vector<4x16x16xf32>, i32 -> vector<4x16x16xf32>
    %c1_i32_13 = arith.constant 1 : i32
    %105 = vector.broadcast %c1_i32_13 : i32 to vector<1x16x16xi32>
    %106 = arith.cmpi sge, %91, %105 : vector<1x16x16xi32>
    %107 = vector.shape_cast %106 : vector<1x16x16xi1> to vector<1x16x16xi1>
    %108 = vector.broadcast %107 : vector<1x16x16xi1> to vector<4x16x16xi1>
    %109 = vector.shape_cast %92 : vector<4x16x1xf32> to vector<4x16x1xf32>
    %110 = vector.broadcast %109 : vector<4x16x1xf32> to vector<4x16x16xf32>
    %111 = arith.select %108, %104, %110 : vector<4x16x16xi1>, vector<4x16x16xf32>
    %c5_14 = arith.constant 5 : index
    %112 = memref.load %arg1[%c5_14] : memref<9xf32, #tpu.memory_space<smem>>
    %113 = arith.addf %103, %111 : vector<4x16x16xf32>
    %114 = vector.broadcast %112 : f32 to vector<4x16x16xf32>
    %115 = arith.mulf %114, %113 : vector<4x16x16xf32>
    %116 = arith.addf %95, %115 : vector<4x16x16xf32>
    %c14_i32_15 = arith.constant 14 : i32
    %117 = tpu.dynamic_rotate %90 by %c14_i32_15 dim 2 : vector<4x16x16xf32>, i32 -> vector<4x16x16xf32>
    %c14_i32_16 = arith.constant 14 : i32
    %118 = vector.broadcast %c14_i32_16 : i32 to vector<1x16x16xi32>
    %119 = arith.cmpi slt, %91, %118 : vector<1x16x16xi32>
    %120 = vector.shape_cast %119 : vector<1x16x16xi1> to vector<1x16x16xi1>
    %121 = vector.broadcast %120 : vector<1x16x16xi1> to vector<4x16x16xi1>
    %122 = vector.shape_cast %93 : vector<4x16x1xf32> to vector<4x16x1xf32>
    %123 = vector.broadcast %122 : vector<4x16x1xf32> to vector<4x16x16xf32>
    %124 = arith.select %121, %117, %123 : vector<4x16x16xi1>, vector<4x16x16xf32>
    %c2_i32_17 = arith.constant 2 : i32
    %125 = tpu.dynamic_rotate %90 by %c2_i32_17 dim 2 : vector<4x16x16xf32>, i32 -> vector<4x16x16xf32>
    %c2_i32_18 = arith.constant 2 : i32
    %126 = vector.broadcast %c2_i32_18 : i32 to vector<1x16x16xi32>
    %127 = arith.cmpi sge, %91, %126 : vector<1x16x16xi32>
    %128 = vector.shape_cast %127 : vector<1x16x16xi1> to vector<1x16x16xi1>
    %129 = vector.broadcast %128 : vector<1x16x16xi1> to vector<4x16x16xi1>
    %130 = vector.shape_cast %92 : vector<4x16x1xf32> to vector<4x16x1xf32>
    %131 = vector.broadcast %130 : vector<4x16x1xf32> to vector<4x16x16xf32>
    %132 = arith.select %129, %125, %131 : vector<4x16x16xi1>, vector<4x16x16xf32>
    %c6_19 = arith.constant 6 : index
    %133 = memref.load %arg1[%c6_19] : memref<9xf32, #tpu.memory_space<smem>>
    %134 = arith.addf %124, %132 : vector<4x16x16xf32>
    %135 = vector.broadcast %133 : f32 to vector<4x16x16xf32>
    %136 = arith.mulf %135, %134 : vector<4x16x16xf32>
    %137 = arith.addf %116, %136 : vector<4x16x16xf32>
    %c13_i32_20 = arith.constant 13 : i32
    %138 = tpu.dynamic_rotate %90 by %c13_i32_20 dim 2 : vector<4x16x16xf32>, i32 -> vector<4x16x16xf32>
    %c13_i32_21 = arith.constant 13 : i32
    %139 = vector.broadcast %c13_i32_21 : i32 to vector<1x16x16xi32>
    %140 = arith.cmpi slt, %91, %139 : vector<1x16x16xi32>
    %141 = vector.shape_cast %140 : vector<1x16x16xi1> to vector<1x16x16xi1>
    %142 = vector.broadcast %141 : vector<1x16x16xi1> to vector<4x16x16xi1>
    %143 = vector.shape_cast %93 : vector<4x16x1xf32> to vector<4x16x1xf32>
    %144 = vector.broadcast %143 : vector<4x16x1xf32> to vector<4x16x16xf32>
    %145 = arith.select %142, %138, %144 : vector<4x16x16xi1>, vector<4x16x16xf32>
    %c3_i32_22 = arith.constant 3 : i32
    %146 = tpu.dynamic_rotate %90 by %c3_i32_22 dim 2 : vector<4x16x16xf32>, i32 -> vector<4x16x16xf32>
    %c3_i32_23 = arith.constant 3 : i32
    %147 = vector.broadcast %c3_i32_23 : i32 to vector<1x16x16xi32>
    %148 = arith.cmpi sge, %91, %147 : vector<1x16x16xi32>
    %149 = vector.shape_cast %148 : vector<1x16x16xi1> to vector<1x16x16xi1>
    %150 = vector.broadcast %149 : vector<1x16x16xi1> to vector<4x16x16xi1>
    %151 = vector.shape_cast %92 : vector<4x16x1xf32> to vector<4x16x1xf32>
    %152 = vector.broadcast %151 : vector<4x16x1xf32> to vector<4x16x16xf32>
    %153 = arith.select %150, %146, %152 : vector<4x16x16xi1>, vector<4x16x16xf32>
    %c7_24 = arith.constant 7 : index
    %154 = memref.load %arg1[%c7_24] : memref<9xf32, #tpu.memory_space<smem>>
    %155 = arith.addf %145, %153 : vector<4x16x16xf32>
    %156 = vector.broadcast %154 : f32 to vector<4x16x16xf32>
    %157 = arith.mulf %156, %155 : vector<4x16x16xf32>
    %158 = arith.addf %137, %157 : vector<4x16x16xf32>
    %c12_i32_25 = arith.constant 12 : i32
    %159 = tpu.dynamic_rotate %90 by %c12_i32_25 dim 2 : vector<4x16x16xf32>, i32 -> vector<4x16x16xf32>
    %c12_i32_26 = arith.constant 12 : i32
    %160 = vector.broadcast %c12_i32_26 : i32 to vector<1x16x16xi32>
    %161 = arith.cmpi slt, %91, %160 : vector<1x16x16xi32>
    %162 = vector.shape_cast %161 : vector<1x16x16xi1> to vector<1x16x16xi1>
    %163 = vector.broadcast %162 : vector<1x16x16xi1> to vector<4x16x16xi1>
    %164 = vector.shape_cast %93 : vector<4x16x1xf32> to vector<4x16x1xf32>
    %165 = vector.broadcast %164 : vector<4x16x1xf32> to vector<4x16x16xf32>
    %166 = arith.select %163, %159, %165 : vector<4x16x16xi1>, vector<4x16x16xf32>
    %c4_i32_27 = arith.constant 4 : i32
    %167 = tpu.dynamic_rotate %90 by %c4_i32_27 dim 2 : vector<4x16x16xf32>, i32 -> vector<4x16x16xf32>
    %c4_i32_28 = arith.constant 4 : i32
    %168 = vector.broadcast %c4_i32_28 : i32 to vector<1x16x16xi32>
    %169 = arith.cmpi sge, %91, %168 : vector<1x16x16xi32>
    %170 = vector.shape_cast %169 : vector<1x16x16xi1> to vector<1x16x16xi1>
    %171 = vector.broadcast %170 : vector<1x16x16xi1> to vector<4x16x16xi1>
    %172 = vector.shape_cast %92 : vector<4x16x1xf32> to vector<4x16x1xf32>
    %173 = vector.broadcast %172 : vector<4x16x1xf32> to vector<4x16x16xf32>
    %174 = arith.select %171, %167, %173 : vector<4x16x16xi1>, vector<4x16x16xf32>
    %c8_29 = arith.constant 8 : index
    %175 = memref.load %arg1[%c8_29] : memref<9xf32, #tpu.memory_space<smem>>
    %176 = arith.addf %166, %174 : vector<4x16x16xf32>
    %177 = vector.broadcast %175 : f32 to vector<4x16x16xf32>
    %178 = arith.mulf %177, %176 : vector<4x16x16xf32>
    %179 = arith.addf %158, %178 : vector<4x16x16xf32>
    %c0_30 = arith.constant 0 : index
    %c0_31 = arith.constant 0 : index
    %c0_32 = arith.constant 0 : index
    %180 = vector.load %arg3[%c0_30, %c0_31, %c0_32] : memref<4x16x16xf32, #tpu.memory_space<vmem>>, vector<4x16x16xf32>
    tpu.vector_store %arg3[%c0_30, %c0_31, %c0_32], %179 {strides = array<i32>} : memref<4x16x16xf32, #tpu.memory_space<vmem>>, vector<4x16x16xf32>,
    return
  }
  func.func @transform_0(%arg0: i32) -> i32 {
    %c0_i32 = arith.constant 0 : i32
    %c0_i32_0 = arith.constant 0 : i32
    return %c0_i32 : i32
  }
  func.func @transform_1(%arg0: i32) -> (i32, i32, i32) {
    %c0_i32 = arith.constant 0 : i32
    %c0_i32_0 = arith.constant 0 : i32
    %c0_i32_1 = arith.constant 0 : i32
    return %arg0, %c0_i32, %c0_i32_0 : i32, i32, i32
  }
  func.func @transform_2(%arg0: i32) -> (i32, i32, i32) {
    %c0_i32 = arith.constant 0 : i32
    %c0_i32_0 = arith.constant 0 : i32
    %c0_i32_1 = arith.constant 0 : i32
    return %arg0, %c0_i32, %c0_i32_0 : i32, i32, i32
  }
}

</mosaic_0001>

<bundles_post_ra>
// kernel: branch_1_fun.1
= control target key start
LH: loop header
LB: loop body
LE: loop exit
PB: predicated region body
PF: predicated region fallthrough
CT: control target
= control target key end

     0   :  { %7 = vsyncpa [#allocation4], 0  ;;  %s2480_s0 = inlined_call_operand.vmem [shape: f32[9], index: 0, kind: input, shape index: {}]   ;;  %s2481_s1 = inlined_call_operand.vmem [shape: f32[8,16,16], index: 1, kind: input, shape index: {}]   ;;  %s2482_s2 = inlined_call_operand.hbm [shape: f32[8,16,16], index: 2, kind: output, shape index: {}]  }
   0x1   :  { %8 = vsyncpa [#allocation3], 0 }
   0x2   :  { %10 = vsyncpa [#allocation3 + $0x1], 0  ;;  %s1367_s9 = smov 0   ;;  %s1369_s10 = smov 0  }
   0x3   :  { %s1371_s11 = smov 0   ;;  %s1373_s12 = smov 0  }
   0x4 LB: > { %s1388_s13 = sadd.s32 4294967295, %s1335_s12   ;;  %s1163_s14 = sadd.s32 4294967294, %s1335_s12   ;;  %s1335_s12 = sphi %s1373_s12, %s2489_s12   ;;  %s1331_s11 = sphi %s1371_s11, %s2488_s11   ;;  %s1327_s10 = sphi %s1369_s10, %s2487_s10   ;;  %s1323_s9 = sphi %s1367_s9, %s2486_s9  }
   0x5   : > { %s1392_s15 = sadd.s32 1, %s1335_s12   ;;  %s70_s16 = sadd.s32 1, %s1331_s11 }
   0x6   : > { %s67_s17 = ssub.s32 %s1335_s12, %s1392_s15  ;;  %p80_p0 = scmp.ne.s32.totalorder %s1331_s11, %s1327_s10 }
   0x7   : > { %p68_p1 = scmp.eq.s32.totalorder %s67_s17, 0  ;;  %p81_p2 = scmp.eq.s32.totalorder %s1388_s13, 1 }
   0x8   : > { %p86_p3 = scmp.ne.s32.totalorder %s1327_s10, %s1323_s9  ;;  %p87_p4 = scmp.eq.s32.totalorder %s1163_s14, 1 }
   0x9   : > { %s1403_s18 = scalar_select %p68_p1, %s1331_s11, %s70_s16  }
   0xa   : > { %p1405_p5 = por %p81_p2, %p80_p0  ;;  %p1409_p6 = por %p87_p4, %p86_p3 }
   0xb   : > { %p1164_p7 = scmp.ge.s32.totalorder %s1335_s12, 1  ;;  %p94_p8 = scmp.lt.s32.totalorder %s1335_s12, 3 }
   0xc   : > { %p1201_p9 = scmp.eq.s32.totalorder %s1388_s13, 0  ;;  %s107_s24 = sshll.u32 %s2480_s0, 4  ;;  %s108_s24 = int_to_ptr.vmem [resolvable:$true] %s107_s24 }
   0xd   : > { %p1416_p10 = pnand %p1164_p7, %p94_p8  ;;  %s1254_s25 = scalar_lea.vmem %s108_s24, 16 }
   0xe   : > { %p1255_p13 = scmp.ne.s32.totalorder %s108_s24, %s1254_s25  ;;  %p1262_p3 = scmp.lt.s32.totalorder %s108_s24, %s108_s24 }
   0xf   : > { %p1193_p11 = pneg %p1416_p10  ;;  %p1263_p4 = scmp.lt.s32.totalorder %s1254_s25, %s1254_s25 }
  0x11   : > { %p1194_p12 = pnand %p1201_p9, %p1193_p11  ;;  %p1264_p7 = por %p1263_p4, %p1262_p3 }
  0x13   : > { %p1256_p0 = pneg %p1194_p12 }
  0x15   : > { %p1257_p1 = pnand %p1256_p0, %p1255_p13 }
  0x17   : > { %p1258_p2 = pneg %p1257_p1 }
  0x19   : > { %p1265_p8 = pnand %p1264_p7, %p1258_p2 }
  0x1b   : > { %1268 = shalt.err (!%p1265_p8)
}
  0x1c   : > { %s1337_s26 = smov [#allocation2]   ;;  %130 = sbr.rel (%p1416_p10) target bundleno = 600 (0x258), region = 28 }
  0x1d   : > { %1196 = dma.vmem_to_smem (!%p1194_p12), %s108_s24, 16, %s1337_s26, [#allocation4]  }
  0x23   : > { %1314 = dma.done.wait (%p1201_p9), [#allocation4], 16  }
  0x24   : > { %1316 = vsyncadd (%p1201_p9), [#allocation4], 4294967280 }
  0x25   : > { %136 = sfence }
  0x26   : > { %s1170_s27 = sshll.u32 %s1388_s13, 2  ;;  %s1173_s28 = sld [smem:[#allocation2 + $0x4]]  ;;  %v171_v0 = vlaneseq  ;;  %v1338_v1 = vmov 15   ;;  %vm560_vm15 = vcmask 1047680  }
  0x27   : > { %p155_p11 = scmp.lt.s32.totalorder %s1170_s27, 7  ;;  %s1174_s29 = sld [smem:[#allocation2 + $0x5]]  ;;  %1251 = vset.pattern.permute.xlu1 %v1338_v1  ;;  %1250 = vset.pattern.permute.xlu0 %v1338_v1 }
  0x28   : > { %v1435_v2 = vshrl.u32 %v171_v0, 7  ;;  %s1437_s30 = sld [smem:[#allocation2 + $0x6]]  ;;  %s1445_s3 = sld [smem:[#allocation2 + $0x7]] }
  0x29   : > { %s2491_s27 = smov (!%p155_p11, %s1170_s27), 7  ;;  %s1461_s8 = sld [smem:[#allocation2 + $0x8]] }
  0x2a   : > { %vm191_vm0 = vcmp.lt.s32.totalorder %v1435_v2, 7  ;;  %vm238_vm1 = vcmp.lt.s32.totalorder %v1435_v2, 1  ;;  %vm247_vm2 = vcmp.ge.s32.totalorder %v1435_v2, 1  ;;  %v1443_v3 = vsub.s32 0, %v1435_v2  ;;  %s1184_s4 = sshll.u32 %s2491_s27, 4  ;;  %s1339_s14 = smov 16  }
  0x2b   : > { %vm311_vm3 = vcmp.lt.s32.totalorder %v1435_v2, 6  ;;  %vm342_vm4 = vcmp.lt.s32.totalorder %v1435_v2, 2  ;;  %vm351_vm5 = vcmp.ge.s32.totalorder %v1435_v2, 2  ;;  %vm399_vm6 = vcmp.lt.s32.totalorder %v1435_v2, 5  ;;  %s1454_s7 = scalar_lea.vmem %s2481_s1, %s1184_s4  ;;  %s1341_s16 = smov 127  }
  0x2c   : > { %v1456_v4 = vstv %s1173_s28  ;;  %vm430_vm7 = vcmp.lt.s32.totalorder %v1435_v2, 3  ;;  %vm439_vm8 = vcmp.ge.s32.totalorder %v1435_v2, 3  ;;  %vm487_vm9 = vcmp.lt.s32.totalorder %v1435_v2, 4  ;;  %v1464_v5 = vld [vmem:[%s1454_s7] sm:$0xff]  ;;  %v1467_v6 = vld [vmem:[%s1454_s7 + $0x8] sm:$0xff]  ;;  %v1543_v38 = vld [vmem:[%s1454_s7 + $0x10] sm:$0xff] }
  0x2d   : > { %v1469_v7 = vstv %s1174_s29  ;;  %vm510_vm10 = vcmp.ge.s32.totalorder %v1435_v2, 4  ;;  %v1473_v8 = vadd.s32 8, %v1435_v2  ;;  %v1476_v9 = vsub.s32 7, %v1435_v2  ;;  %v1546_v39 = vld [vmem:[%s1454_s7 + $0x18] sm:$0xff]  ;;  %s1342_s17 = smov 113   ;;  %s1343_s21 = smov 126  }
  0x2e   : > { %v175_v10 = vmul.f32 %v1456_v4, %v1464_v5  ;;  %v183_v11 = vrot.slane %v1464_v5, 1  ;;  %v187_v12 = vrot.slane %v1467_v6, 1  ;;  %v230_v13 = vrot.slane %v1464_v5, 7  ;;  %s1344_s22 = smov 114   ;;  %s1345_s23 = smov 125  }
  0x2f   : > { %v234_v14 = vrot.slane %v1467_v6, 7  ;;  %v256_v15 = vrot.slane %v1464_v5, %v1443_v3  ;;  %v303_v16 = vrot.slane %v1464_v5, 2  ;;  %v307_v17 = vrot.slane %v1467_v6, 2  ;;  %s1346_s24 = smov 115   ;;  %s1347_s25 = smov 124  }
  0x30   : > { %v192_v18 = vsel %vm191_vm0, %v183_v11, %v187_v12  ;;  %v334_v19 = vrot.slane %v1464_v5, 6  ;;  %v338_v20 = vrot.slane %v1467_v6, 6  ;;  %v1497_v21 = vstv %s1437_s30  ;;  %s1348_s26 = smov 116   ;;  %s151_s27 = sand.u32 1, %s1327_s10  }
  0x31   : > { %v243_v22 = vsel %vm238_vm1, %v234_v14, %v230_v13  ;;  %v312_v23 = vsel %vm311_vm3, %v303_v16, %v307_v17  ;;  %v391_v24 = vrot.slane %v1464_v5, 3  ;;  %v395_v25 = vrot.slane %v1467_v6, 3  ;;  %s1169_s28 = sshll.u32 %s151_s27, 6  ;;  %s1186_s30 = sshll.u32 %s1388_s13, 10 }
  0x32   : > { %v269_v26 = vsel %vm247_vm2, %v243_v22, %v256_v15  ;;  %v347_v27 = vsel %vm342_vm4, %v338_v20, %v334_v19  ;;  %v422_v28 = vrot.slane %v1464_v5, 5  ;;  %v426_v29 = vrot.slane %v1467_v6, 5  ;;  %s2344_s29 = scalar_lea.vmem [#allocation5], %s1169_s28  ;;  %s2431_s6 = scalar_lea.hbm %s2482_s2, %s1186_s30 }
  0x33   : > { %v278_v30 = vadd.f32 %v269_v26, %v192_v18  ;;  %v357_v31 = vsel %vm351_vm5, %v347_v27, %v256_v15  ;;  %v400_v32 = vsel %vm399_vm6, %v391_v24, %v395_v25  ;;  %v1532_v33 = vstv %s1445_s3  ;;  %s1089_s3 = sshll.u32 %s2344_s29, 4  ;;  %s2439_s13 = scalar_lea.sflag [#allocation3], %s151_s27  ;;  %s2433_s3 = int_to_ptr.vmem [resolvable:$true] %s1089_s3 }
  0x34   : > { %v366_v34 = vadd.f32 %v357_v31, %v312_v23  ;;  %v435_v35 = vsel %vm430_vm7, %v426_v29, %v422_v28  ;;  %v479_v36 = vrot.slane %v1464_v5, 4  ;;  %v483_v37 = vrot.slane %v1467_v6, 4 }
  0x35   : > { %v287_v40 = vmul.f32 %v1469_v7, %v278_v30  ;;  %v445_v41 = vsel %vm439_vm8, %v435_v35, %v256_v15  ;;  %v1552_v42 = vstv %s1461_s8  ;;  %v177_v43 = vmul.f32 %v1456_v4, %v1543_v38  ;;  %s1349_s8 = smov [#allocation5]  }
  0x36   : > { %v375_v44 = vmul.f32 %v1497_v21, %v366_v34  ;;  %v454_v45 = vadd.f32 %v445_v41, %v400_v32  ;;  %v1559_v46 = vsel %vm487_vm9, %v479_v36, %v483_v37  ;;  %v1563_v47 = vsel %vm487_vm9, %v483_v37, %v479_v36 }
  0x37   : > { %v295_v48 = vadd.f32 %v287_v40, %v175_v10  ;;  %v516_v49 = vsel %vm510_vm10, %v1563_v47, %v256_v15  ;;  %v184_v50 = vrot.slane %v1543_v38, 1  ;;  %v188_v51 = vrot.slane %v1546_v39, 1 }
  0x38   : > { %v463_v52 = vmul.f32 %v1532_v33, %v454_v45  ;;  %v525_v53 = vadd.f32 %v516_v49, %v1559_v46  ;;  %v231_v54 = vrot.slane %v1543_v38, 7  ;;  %v235_v55 = vrot.slane %v1546_v39, 7 }
  0x39   : > { %v383_v56 = vadd.f32 %v375_v44, %v295_v48  ;;  %v193_v57 = vsel %vm191_vm0, %v184_v50, %v188_v51  ;;  %v260_v58 = vrot.slane %v1543_v38, %v1443_v3  ;;  %v304_v59 = vrot.slane %v1543_v38, 2 }
  0x3a   : > { %v534_v60 = vmul.f32 %v1552_v42, %v525_v53  ;;  %v244_v61 = vsel %vm238_vm1, %v235_v55, %v231_v54  ;;  %v308_v62 = vrot.slane %v1546_v39, 2  ;;  %v335_v63 = vrot.slane %v1543_v38, 6 }
  0x3b   : > { %v471_v1 = vadd.f32 %v463_v52, %v383_v56  ;;  %v271_v10 = vsel %vm247_vm2, %v244_v61, %v260_v58  ;;  %v339_v15 = vrot.slane %v1546_v39, 6  ;;  %v392_v18 = vrot.slane %v1543_v38, 3 }
  0x3c   : > { %v280_v22 = vadd.f32 %v271_v10, %v193_v57  ;;  %v313_v23 = vsel %vm311_vm3, %v304_v59, %v308_v62  ;;  %v396_v26 = vrot.slane %v1546_v39, 3  ;;  %v423_v27 = vrot.slane %v1543_v38, 5 }
  0x3d   : > { %v1604_v30 = vadd.f32 %v534_v60, %v471_v1  ;;  %v348_v31 = vsel %vm342_vm4, %v339_v15, %v335_v63  ;;  %v427_v32 = vrot.slane %v1546_v39, 5  ;;  %v480_v34 = vrot.slane %v1543_v38, 4 }
  0x3e   : > { %v289_v35 = vmul.f32 %v1469_v7, %v280_v22  ;;  %v359_v36 = vsel %vm351_vm5, %v348_v31, %v260_v58  ;;  %v401_v37 = vsel %vm399_vm6, %v392_v18, %v396_v26  ;;  %v484_v40 = vrot.slane %v1546_v39, 4 }
  0x3f   : > { %561 = vrot.lane.b32.xlu0 %v1604_v30, %s1339_s14  ;;  %v368_v41 = vadd.f32 %v359_v36, %v313_v23  ;;  %v436_v44 = vsel %vm430_vm7, %v427_v32, %v423_v27  ;;  %v176_v45 = vmul.f32 %v1456_v4, %v1467_v6  ;;  %v196_v48 = vsel %vm191_vm0, %v187_v12, %v183_v11 }
  0x40   : > { %v297_v49 = vadd.f32 %v289_v35, %v177_v43  ;;  %v447_v52 = vsel %vm439_vm8, %v436_v44, %v260_v58  ;;  %v489_v53 = vsel %vm487_vm9, %v480_v34, %v484_v40  ;;  %v493_v56 = vsel %vm487_vm9, %v484_v40, %v480_v34 }
  0x41   : > { %v377_v57 = vmul.f32 %v1497_v21, %v368_v41  ;;  %v456_v60 = vadd.f32 %v447_v52, %v401_v37  ;;  %v518_v61 = vsel %vm510_vm10, %v493_v56, %v260_v58  ;;  %vm201_vm11 = vcmp.lt.s32.totalorder %v1473_v8, 15 }
  0x42   : > { %v527_v1 = vadd.f32 %v518_v61, %v489_v53  ;;  %v209_v11 = vrot.slane %v1467_v6, %v1476_v9  ;;  %v239_v12 = vsel %vm238_vm1, %v230_v13, %v234_v14  ;;  %v316_v43 = vsel %vm311_vm3, %v307_v17, %v303_v16 }
  0x43   : > { %v385_v58 = vadd.f32 %v377_v57, %v297_v49  ;;  %v465_v10 = vmul.f32 %v1532_v33, %v456_v60  ;;  %vm321_vm12 = vcmp.lt.s32.totalorder %v1473_v8, 14  ;;  %v343_v22 = vsel %vm342_vm4, %v334_v19, %v338_v20  ;;  %v1743_v49 = vld [vmem:[%s1454_s7 + $0x28] sm:$0xff] }
  0x44   : > { %v536_v13 = vmul.f32 %v1552_v42, %v527_v1  ;;  %v223_v14 = vsel %vm201_vm11, %v196_v48, %v209_v11  ;;  %v327_v16 = vsel %vm321_vm12, %v316_v43, %v209_v11  ;;  %v404_v17 = vsel %vm399_vm6, %v395_v25, %v391_v24  ;;  %v1740_v48 = vld [vmem:[%s1454_s7 + $0x20] sm:$0xff] }
  0x45   : > { %v473_v23 = vadd.f32 %v465_v10, %v385_v58  ;;  %v279_v31 = vadd.f32 %v239_v12, %v223_v14  ;;  %v367_v34 = vadd.f32 %v343_v22, %v327_v16  ;;  %vm409_vm13 = vcmp.lt.s32.totalorder %v1473_v8, 13 }
  0x46   : > { %v415_v19 = vsel %vm409_vm13, %v404_v17, %v209_v11  ;;  %v431_v20 = vsel %vm430_vm7, %v422_v28, %v426_v29  ;;  %vm497_vm14 = vcmp.lt.s32.totalorder %v1473_v8, 12  ;;  %v178_v24 = vmul.f32 %v1456_v4, %v1546_v39 }
  0x47   : > { %v1693_v25 = vadd.f32 %v536_v13, %v473_v23  ;;  %v288_v35 = vmul.f32 %v1469_v7, %v279_v31  ;;  %v376_v36 = vmul.f32 %v1497_v21, %v367_v34  ;;  %v455_v37 = vadd.f32 %v431_v20, %v415_v19 }
  0x48   : > { %v503_v6 = vsel %vm497_vm14, %v1563_v47, %v209_v11  ;;  %v197_v5 = vsel %vm191_vm0, %v188_v51, %v184_v50  ;;  %v213_v28 = vrot.slane %v1546_v39, %v1476_v9  ;;  %v240_v29 = vsel %vm238_vm1, %v231_v54, %v235_v55 }
  0x49   : > { %567 = vrot.lane.b32.xlu1 %v1693_v25, %s1339_s14  ;;  %v296_v47 = vadd.f32 %v288_v35, %v176_v45  ;;  %v464_v40 = vmul.f32 %v1532_v33, %v455_v37  ;;  %v526_v50 = vadd.f32 %v503_v6, %v1559_v46  ;;  %v317_v51 = vsel %vm311_vm3, %v308_v62, %v304_v59 }
  0x4a   : > { %v225_v41 = vsel %vm201_vm11, %v197_v5, %v213_v28  ;;  %v329_v54 = vsel %vm321_vm12, %v317_v51, %v213_v28  ;;  %v344_v46 = vsel %vm342_vm4, %v335_v63, %v339_v15  ;;  %v405_v55 = vsel %vm399_vm6, %v396_v26, %v392_v18 }
  0x4b   : > { %v384_v44 = vadd.f32 %v376_v36, %v296_v47  ;;  %v535_v59 = vmul.f32 %v1552_v42, %v526_v50  ;;  %v281_v62 = vadd.f32 %v240_v29, %v225_v41  ;;  %v369_v45 = vadd.f32 %v344_v46, %v329_v54 }
  0x4c   : > { %v417_v52 = vsel %vm409_vm13, %v405_v55, %v213_v28  ;;  %v432_v63 = vsel %vm430_vm7, %v423_v27, %v427_v32  ;;  %v505_v15 = vsel %vm497_vm14, %v493_v56, %v213_v28  ;;  %v179_v18 = vmul.f32 %v1456_v4, %v1740_v48 }
  0x4d   : > { %v472_v26 = vadd.f32 %v464_v40, %v384_v44  ;;  %v290_v57 = vmul.f32 %v1469_v7, %v281_v62  ;;  %v378_v60 = vmul.f32 %v1497_v21, %v369_v45  ;;  %v457_v61 = vadd.f32 %v432_v63, %v417_v52 }
  0x4e   : > { %v528_v1 = vadd.f32 %v505_v15, %v489_v53  ;;  %v185_v39 = vrot.slane %v1740_v48, 1  ;;  %v189_v38 = vrot.slane %v1743_v49, 1  ;;  %v232_v11 = vrot.slane %v1740_v48, 7 }
  0x4f   : > { %v1762_v27 = vadd.f32 %v535_v59, %v472_v26  ;;  %v298_v32 = vadd.f32 %v290_v57, %v178_v24  ;;  %v466_v56 = vmul.f32 %v1532_v33, %v457_v61  ;;  %v236_v12 = vrot.slane %v1743_v49, 7 }
  0x50   : > { %v537_v43 = vmul.f32 %v1552_v42, %v528_v1  ;;  %v194_v58 = vsel %vm191_vm0, %v185_v39, %v189_v38  ;;  %v264_v53 = vrot.slane %v1740_v48, %v1443_v3  ;;  %v305_v10 = vrot.slane %v1740_v48, 2 }
  0x51   : > { %564 = vrot.lane.b32.xlu0 %v1762_v27, %s1339_s14  ;;  %v386_v22 = vadd.f32 %v378_v60, %v298_v32  ;;  %v245_v13 = vsel %vm238_vm1, %v236_v12, %v232_v11  ;;  %v309_v14 = vrot.slane %v1743_v49, 2  ;;  %v336_v16 = vrot.slane %v1740_v48, 6  ;;  %v1832_v32 = vld [vmem:[%s1454_s7 + $0x30] sm:$0xff] }
  0x52   : > { %v273_v17 = vsel %vm247_vm2, %v245_v13, %v264_v53  ;;  %v340_v23 = vrot.slane %v1743_v49, 6  ;;  %v393_v31 = vrot.slane %v1740_v48, 3  ;;  %v397_v34 = vrot.slane %v1743_v49, 3 }
  0x53   : > { %v474_v19 = vadd.f32 %v466_v56, %v386_v22  ;;  %v282_v20 = vadd.f32 %v273_v17, %v194_v58  ;;  %v314_v24 = vsel %vm311_vm3, %v305_v10, %v309_v14  ;;  %v424_v35 = vrot.slane %v1740_v48, 5  ;;  %v1835_v56 = vld [vmem:[%s1454_s7 + $0x38] sm:$0xff]  ;;  %s1269_s7 = scalar_lea.vmem %s2433_s3, 1024 }
  0x54   : > { %v349_v36 = vsel %vm342_vm4, %v340_v23, %v336_v16  ;;  %v402_v37 = vsel %vm399_vm6, %v393_v31, %v397_v34  ;;  %v428_v6 = vrot.slane %v1743_v49, 5  ;;  %v481_v5 = vrot.slane %v1740_v48, 4  ;;  %p1270_p9 = scmp.ne.s32.totalorder %s2433_s3, %s1269_s7 }
  0x55   : > { %v1792_v28 = vadd.f32 %v537_v43, %v474_v19  ;;  %v291_v29 = vmul.f32 %v1469_v7, %v282_v20  ;;  %v361_v47 = vsel %vm351_vm5, %v349_v36, %v264_v53  ;;  %v485_v40 = vrot.slane %v1743_v49, 4 }
  0x56   : > { %v370_v50 = vadd.f32 %v361_v47, %v314_v24  ;;  %v437_v51 = vsel %vm430_vm7, %v428_v6, %v424_v35  ;;  %v180_v41 = vmul.f32 %v1456_v4, %v1743_v49  ;;  %v198_v54 = vsel %vm191_vm0, %v189_v38, %v185_v39  ;;  %p1271_p10 = pnand %p1270_p9, %p1405_p5 }
  0x57   : > { %570 = vrot.lane.b32.xlu1 %v1792_v28, %s1339_s14  ;;  %v299_v46 = vadd.f32 %v291_v29, %v179_v18  ;;  %v449_v55 = vsel %vm439_vm8, %v437_v51, %v264_v53  ;;  %v490_v44 = vsel %vm487_vm9, %v481_v5, %v485_v40  ;;  %v494_v59 = vsel %vm487_vm9, %v485_v40, %v481_v5 }
  0x58   : > { %v379_v62 = vmul.f32 %v1497_v21, %v370_v50  ;;  %v458_v45 = vadd.f32 %v449_v55, %v402_v37  ;;  %v520_v48 = vsel %vm510_vm10, %v494_v59, %v264_v53  ;;  %v217_v52 = vrot.slane %v1743_v49, %v1476_v9  ;;  %p1272_p12 = pneg %p1271_p10 }
  0x59   : > { %v529_v63 = vadd.f32 %v520_v48, %v490_v44  ;;  %v241_v15 = vsel %vm238_vm1, %v232_v11, %v236_v12  ;;  %v318_v18 = vsel %vm311_vm3, %v309_v14, %v305_v10  ;;  %v345_v26 = vsel %vm342_vm4, %v336_v16, %v340_v23 }
  0x5a   : > { %v387_v57 = vadd.f32 %v379_v62, %v299_v46  ;;  %v467_v60 = vmul.f32 %v1532_v33, %v458_v45  ;;  %v227_v61 = vsel %vm201_vm11, %v198_v54, %v217_v52  ;;  %v331_v1 = vsel %vm321_vm12, %v318_v18, %v217_v52 }
  0x5b   : > { %v538_v49 = vmul.f32 %v1552_v42, %v529_v63  ;;  %v283_v39 = vadd.f32 %v241_v15, %v227_v61  ;;  %v371_v38 = vadd.f32 %v345_v26, %v331_v1  ;;  %v406_v11 = vsel %vm399_vm6, %v397_v34, %v393_v31 }
  0x5c   : > { %v475_v12 = vadd.f32 %v467_v60, %v387_v57  ;;  %v419_v43 = vsel %vm409_vm13, %v406_v11, %v217_v52  ;;  %v433_v58 = vsel %vm430_vm7, %v424_v35, %v428_v6  ;;  %v507_v53 = vsel %vm497_vm14, %v494_v59, %v217_v52 }
  0x5d   : > { %v292_v10 = vmul.f32 %v1469_v7, %v283_v39  ;;  %v380_v22 = vmul.f32 %v1497_v21, %v371_v38  ;;  %v459_v13 = vadd.f32 %v433_v58, %v419_v43  ;;  %v530_v14 = vadd.f32 %v507_v53, %v490_v44 }
  0x5e   : > { %v1845_v16 = vadd.f32 %v538_v49, %v475_v12  ;;  %v181_v17 = vmul.f32 %v1456_v4, %v1832_v32  ;;  %v186_v23 = vrot.slane %v1832_v32, 1  ;;  %v190_v31 = vrot.slane %v1835_v56, 1 }
  0x5f   : > { %v300_v34 = vadd.f32 %v292_v10, %v180_v41  ;;  %v468_v19 = vmul.f32 %v1532_v33, %v459_v13  ;;  %v539_v20 = vmul.f32 %v1552_v42, %v530_v14  ;;  %v233_v24 = vrot.slane %v1832_v32, 7 }
  0x60   : > { %573 = vrot.lane.b32.xlu0 %v1845_v16, %s1339_s14  ;;  %v195_v35 = vsel %vm191_vm0, %v186_v23, %v190_v31  ;;  %v237_v36 = vrot.slane %v1835_v56, 7  ;;  %v268_v37 = vrot.slane %v1832_v32, %v1443_v3  ;;  %v306_v6 = vrot.slane %v1832_v32, 2 }
  0x61   : > { %v388_v5 = vadd.f32 %v380_v22, %v300_v34  ;;  %v310_v29 = vrot.slane %v1835_v56, 2  ;;  %v337_v47 = vrot.slane %v1832_v32, 6  ;;  %v341_v40 = vrot.slane %v1835_v56, 6 }
  0x62   : > { %v246_v50 = vsel %vm238_vm1, %v237_v36, %v233_v24  ;;  %v394_v51 = vrot.slane %v1832_v32, 3  ;;  %v398_v41 = vrot.slane %v1835_v56, 3  ;;  %v425_v54 = vrot.slane %v1832_v32, 5 }
  0x63   : > { %v476_v46 = vadd.f32 %v468_v19, %v388_v5  ;;  %v275_v3 = vsel %vm247_vm2, %v246_v50, %v268_v37  ;;  %v315_v55 = vsel %vm311_vm3, %v306_v6, %v310_v29  ;;  %v350_v44 = vsel %vm342_vm4, %v341_v40, %v337_v47 }
  0x64   : > { %v284_v59 = vadd.f32 %v275_v3, %v195_v35  ;;  %v363_v62 = vsel %vm351_vm5, %v350_v44, %v268_v37  ;;  %v403_v45 = vsel %vm399_vm6, %v394_v51, %v398_v41  ;;  %v429_v48 = vrot.slane %v1835_v56, 5 }
  0x65   : > { %v1881_v52 = vadd.f32 %v539_v20, %v476_v46  ;;  %v372_v63 = vadd.f32 %v363_v62, %v315_v55  ;;  %v482_v15 = vrot.slane %v1832_v32, 4  ;;  %v486_v18 = vrot.slane %v1835_v56, 4 }
  0x66   : > { %v293_v26 = vmul.f32 %v1469_v7, %v284_v59  ;;  %v438_v57 = vsel %vm430_vm7, %v429_v48, %v425_v54  ;;  %v182_v60 = vmul.f32 %v1456_v4, %v1835_v56  ;;  %v199_v61 = vsel %vm191_vm0, %v190_v31, %v186_v23 }
  0x67   : > { %576 = vrot.lane.b32.xlu1 %v1881_v52, %s1339_s14  ;;  %v381_v1 = vmul.f32 %v1497_v21, %v372_v63  ;;  %v451_v49 = vsel %vm439_vm8, %v438_v57, %v268_v37  ;;  %v491_v39 = vsel %vm487_vm9, %v482_v15, %v486_v18  ;;  %v495_v38 = vsel %vm487_vm9, %v486_v18, %v482_v15 }
  0x68   : > { %v301_v11 = vadd.f32 %v293_v26, %v181_v17  ;;  %v460_v32 = vadd.f32 %v451_v49, %v403_v45  ;;  %v522_v12 = vsel %vm510_vm10, %v495_v38, %v268_v37  ;;  %v221_v43 = vrot.slane %v1835_v56, %v1476_v9 }
  0x69   : > { %v531_v58 = vadd.f32 %v522_v12, %v491_v39  ;;  %v242_v53 = vsel %vm238_vm1, %v233_v24, %v237_v36  ;;  %v319_v10 = vsel %vm311_vm3, %v310_v29, %v306_v6  ;;  %v346_v22 = vsel %vm342_vm4, %v337_v47, %v341_v40 }
  0x6a   : > { %v389_v13 = vadd.f32 %v381_v1, %v301_v11  ;;  %v469_v14 = vmul.f32 %v1532_v33, %v460_v32  ;;  %v229_v17 = vsel %vm201_vm11, %v199_v61, %v221_v43  ;;  %v333_v23 = vsel %vm321_vm12, %v319_v10, %v221_v43 }
  0x6b   : > { %v540_v9 = vmul.f32 %v1552_v42, %v531_v58  ;;  %v285_v56 = vadd.f32 %v242_v53, %v229_v17  ;;  %v373_v31 = vadd.f32 %v346_v22, %v333_v23  ;;  %v407_v34 = vsel %vm399_vm6, %v398_v41, %v394_v51 }
  0x6c   : > { %v477_v19 = vadd.f32 %v469_v14, %v389_v13  ;;  %v421_v20 = vsel %vm409_vm13, %v407_v34, %v221_v43  ;;  %v434_v24 = vsel %vm430_vm7, %v425_v54, %v429_v48  ;;  %v509_v35 = vsel %vm497_vm14, %v495_v38, %v221_v43 }
  0x6d   : > { %v294_v36 = vmul.f32 %v1469_v7, %v285_v56  ;;  %v382_v37 = vmul.f32 %v1497_v21, %v373_v31  ;;  %v461_v6 = vadd.f32 %v434_v24, %v421_v20  ;;  %v532_v5 = vadd.f32 %v509_v35, %v491_v39 }
  0x6e   : > { %v1927_v29 = vadd.f32 %v540_v9, %v477_v19  ;;  %v1340_v41 = vmov 0   ;;  %vm1065_vm8 = vcmask 130048  }
  0x6f   : > { %v302_v47 = vadd.f32 %v294_v36, %v182_v60  ;;  %v470_v40 = vmul.f32 %v1532_v33, %v461_v6  ;;  %v541_v2 = vmul.f32 %v1552_v42, %v532_v5 }
  0x70   : > { %579 = vrot.lane.b32.xlu0 %v1927_v29, %s1339_s14 }
  0x71   : > { %v390_v50 = vadd.f32 %v382_v37, %v302_v47 }
  0x73   : > { %v478_v51 = vadd.f32 %v470_v40, %v390_v50 }
  0x74   : > { %614 = vperm.xlu0 %1250, %v1604_v30  }
  0x75   : > { %v1934_v8 = vadd.f32 %v541_v2, %v478_v51 }
  0x77   : > { %582 = vrot.lane.b32.xlu1 %v1934_v8, %s1339_s14 }
  0x78   : > { %629 = vperm.xlu0 %1250, %v1792_v28  }
  0x7b   : > { %619 = vperm.xlu1 %1251, %v1762_v27  }
  0x7c   : > { %639 = vperm.xlu0 %1250, %v1881_v52  }
  0x7f   : > { %624 = vperm.xlu1 %1251, %v1693_v25  }
  0x80   : > { %649 = vperm.xlu0 %1250, %v1934_v8  }
  0x83   : > { %634 = vperm.xlu1 %1251, %v1845_v16  }
  0x84   : > { %1253 = vset.pattern.permute.xlu0 %v1340_v41 }
  0x85   : > { %700 = vperm.xlu0 %1253, %v1762_v27  }
  0x87   : > { %644 = vperm.xlu1 %1251, %v1927_v29  }
  0x89   : > { %712 = vperm.xlu0 %1253, %v1845_v16  }
  0x8b   : > { %1252 = vset.pattern.permute.xlu1 %v1340_v41 }
  0x8c   : > { %696 = vperm.xlu1 %1252, %v1604_v30  }
  0x8d   : > { %720 = vperm.xlu0 %1253, %v1927_v29  }
  0x90   : > { %704 = vperm.xlu1 %1252, %v1693_v25  }
  0x94   : > { %708 = vperm.xlu1 %1252, %v1792_v28  }
  0x98   : > { %716 = vperm.xlu1 %1252, %v1881_v52  }
  0x9c   : > { %724 = vperm.xlu1 %1252, %v1934_v8  }
  0xb1   : > { %v562_v54 = vpop.permute.xlu0 %561 }
  0xb2   : > { %v563_v46 = vsel %vm560_vm15, %v562_v54, %v1604_v30 }
  0xb3   : > { %585 = vrot.lane.b32.xlu0 %v563_v46, %s1339_s14 }
  0xbb   : > { %v568_v3 = vpop.permute.xlu1 %567 }
  0xbc   : > { %v569_v55 = vsel %vm560_vm15, %v568_v3, %v1693_v25 }
  0xbd   : > { %589 = vrot.lane.b32.xlu0 %v569_v55, %s1339_s14  ;;  %v2104_v55 = vand.u32 127, %v171_v0 }
  0xbf   : > { %vm692_vm0 = vcmp.ge.s32.totalorder %v2104_v55, 1  ;;  %vm609_vm1 = vcmp.lt.s32.totalorder %v2104_v55, 15  ;;  %vm783_vm2 = vcmp.lt.s32.totalorder %v2104_v55, 14  ;;  %vm818_vm3 = vcmp.ge.s32.totalorder %v2104_v55, 2 }
  0xc0   : > { %vm912_vm4 = vcmp.ge.s32.totalorder %v2104_v55, 3  ;;  %vm877_vm5 = vcmp.lt.s32.totalorder %v2104_v55, 13  ;;  %vm971_vm6 = vcmp.lt.s32.totalorder %v2104_v55, 12  ;;  %vm1006_vm7 = vcmp.ge.s32.totalorder %v2104_v55, 4 }
  0xc3   : > { %v565_v44 = vpop.permute.xlu0 %564 }
  0xc4   : > { %v566_v59 = vsel %vm560_vm15, %v565_v44, %v1762_v27 }
  0xc5   : > { %587 = vrot.lane.b32.xlu1 %v566_v59, %s1339_s14 }
  0xc9   : > { %v571_v62 = vpop.permute.xlu1 %570 }
  0xca   : > { %v572_v45 = vsel %vm560_vm15, %v571_v62, %v1792_v28 }
  0xcb   : > { %591 = vrot.lane.b32.xlu1 %v572_v45, %s1339_s14 }
  0xd2   : > { %v574_v48 = vpop.permute.xlu0 %573 }
  0xd3   : > { %v575_v63 = vsel %vm560_vm15, %v574_v48, %v1845_v16 }
  0xd4   : > { %593 = vrot.lane.b32.xlu0 %v575_v63, %s1339_s14 }
  0xd9   : > { %v577_v15 = vpop.permute.xlu1 %576 }
  0xda   : > { %v578_v18 = vsel %vm560_vm15, %v577_v15, %v1881_v52 }
  0xdb   : > { %595 = vrot.lane.b32.xlu1 %v578_v18, %s1339_s14 }
  0xe2   : > { %v580_v26 = vpop.permute.xlu0 %579 }
  0xe3   : > { %v581_v57 = vsel %vm560_vm15, %v580_v26, %v1927_v29 }
  0xe4   : > { %597 = vrot.lane.b32.xlu0 %v581_v57, %s1339_s14 }
  0xe9   : > { %v583_v60 = vpop.permute.xlu1 %582 }
  0xea   : > { %v584_v61 = vsel %vm560_vm15, %v583_v60, %v1934_v8 }
  0xeb   : > { %599 = vrot.lane.b32.xlu1 %v584_v61, %s1339_s14  ;;  %s1273_s14 = sshll.u32 %s1349_s8, 4  ;;  %s1274_s14 = int_to_ptr.vmem [resolvable:$false] %s1273_s14 }
  0xec   : > { %p1276_p13 = scmp.lt.s32.totalorder %s2433_s3, %s1274_s14 }
  0xf3   : > { %v1977_v1 = vpop.permute.xlu0 %614 }
  0xf7   : > { %v1981_v39 = vpop.permute.xlu0 %629 }
  0xfa   : > { %v1979_v49 = vpop.permute.xlu1 %619 }
  0xfb   : > { %v1985_v11 = vpop.permute.xlu0 %639 }
  0xfe   : > { %v1983_v38 = vpop.permute.xlu1 %624 }
  0xff   : > { %v1989_v12 = vpop.permute.xlu0 %649 }
 0x102   : > { %v1987_v32 = vpop.permute.xlu1 %634 }
 0x104   : > { %v1993_v58 = vpop.permute.xlu0 %700 }
 0x106   : > { %v1991_v43 = vpop.permute.xlu1 %644 }
 0x108   : > { %v1997_v10 = vpop.permute.xlu0 %712 }
 0x10b   : > { %v1995_v53 = vpop.permute.xlu1 %696 }
 0x10c   : > { %v2001_v13 = vpop.permute.xlu0 %720 }
 0x10f   : > { %v1999_v22 = vpop.permute.xlu1 %704 }
 0x113   : > { %v2007_v23 = vpop.permute.xlu1 %708 }
 0x117   : > { %v2010_v9 = vpop.permute.xlu1 %716 }
 0x11b   : > { %v2017_v34 = vpop.permute.xlu1 %724 }
 0x125   : > { %v586_v14 = vpop.permute.xlu0 %585 }
 0x126   : > { %v2005_v17 = vsel %vm560_vm15, %v586_v14, %v1604_v30 }
 0x127   : > { %660 = vrot.lane.b32.xlu1 %v2005_v17, %s1341_s16 }
 0x12f   : > { %v590_v56 = vpop.permute.xlu0 %589 }
 0x130   : > { %v2014_v31 = vsel %vm560_vm15, %v590_v56, %v1693_v25 }
 0x131   : > { %664 = vrot.lane.b32.xlu1 %v2014_v31, %s1341_s16 }
 0x137   : > { %v588_v19 = vpop.permute.xlu1 %587 }
 0x138   : > { %v2021_v20 = vsel %vm560_vm15, %v588_v19, %v1762_v27 }
 0x139   : > { %662 = vrot.lane.b32.xlu0 %v2021_v20, %s1341_s16 }
 0x13d   : > { %v592_v24 = vpop.permute.xlu1 %591 }
 0x13e   : > { %v2026_v35 = vsel %vm560_vm15, %v592_v24, %v1792_v28 }
 0x13f   : > { %666 = vrot.lane.b32.xlu0 %v2026_v35, %s1341_s16 }
 0x146   : > { %v594_v36 = vpop.permute.xlu0 %593 }
 0x147   : > { %v2031_v37 = vsel %vm560_vm15, %v594_v36, %v1845_v16 }
 0x148   : > { %668 = vrot.lane.b32.xlu1 %v2031_v37, %s1341_s16 }
 0x14d   : > { %v596_v6 = vpop.permute.xlu1 %595 }
 0x14e   : > { %v2036_v5 = vsel %vm560_vm15, %v596_v6, %v1881_v52 }
 0x14f   : > { %670 = vrot.lane.b32.xlu0 %v2036_v5, %s1341_s16 }
 0x156   : > { %v598_v47 = vpop.permute.xlu0 %597 }
 0x157   : > { %v2041_v40 = vsel %vm560_vm15, %v598_v47, %v1927_v29 }
 0x158   : > { %672 = vrot.lane.b32.xlu1 %v2041_v40, %s1341_s16 }
 0x15c   : > { %729 = vrot.lane.b32.xlu1 %v2021_v20, %s1342_s17 }
 0x15d   : > { %v600_v50 = vpop.permute.xlu1 %599 }
 0x15e   : > { %v2047_v2 = vsel %vm560_vm15, %v600_v50, %v1934_v8 }
 0x15f   : > { %674 = vrot.lane.b32.xlu0 %v2047_v2, %s1341_s16  ;;  %s1275_s16 = scalar_lea.vmem %s1274_s14, 2048 }
 0x160   : > { %733 = vrot.lane.b32.xlu1 %v2026_v35, %s1342_s17  ;;  %p1277_p0 = scmp.lt.s32.totalorder %s1275_s16, %s1269_s7 }
 0x162   : > { %p1278_p1 = por %p1277_p0, %p1276_p13 }
 0x163   : > { %727 = vrot.lane.b32.xlu0 %v2005_v17, %s1342_s17 }
 0x164   : > { %737 = vrot.lane.b32.xlu1 %v2036_v5, %s1342_s17  ;;  %p1279_p2 = pnand %p1278_p1, %p1272_p12 }
 0x167   : > { %731 = vrot.lane.b32.xlu0 %v2014_v31, %s1342_s17 }
 0x168   : > { %741 = vrot.lane.b32.xlu1 %v2047_v2, %s1342_s17 }
 0x16b   : > { %735 = vrot.lane.b32.xlu0 %v2031_v37, %s1342_s17 }
 0x16c   : > { %788 = vrot.lane.b32.xlu1 %v2021_v20, %s1343_s21 }
 0x16f   : > { %739 = vrot.lane.b32.xlu0 %v2041_v40, %s1342_s17 }
 0x170   : > { %792 = vrot.lane.b32.xlu1 %v2026_v35, %s1343_s21 }
 0x173   : > { %786 = vrot.lane.b32.xlu0 %v2005_v17, %s1343_s21 }
 0x174   : > { %796 = vrot.lane.b32.xlu1 %v2036_v5, %s1343_s21 }
 0x177   : > { %790 = vrot.lane.b32.xlu0 %v2014_v31, %s1343_s21 }
 0x178   : > { %800 = vrot.lane.b32.xlu1 %v2047_v2, %s1343_s21 }
 0x17b   : > { %794 = vrot.lane.b32.xlu0 %v2031_v37, %s1343_s21 }
 0x17c   : > { %823 = vrot.lane.b32.xlu1 %v2021_v20, %s1344_s22 }
 0x17f   : > { %798 = vrot.lane.b32.xlu0 %v2041_v40, %s1343_s21 }
 0x180   : > { %827 = vrot.lane.b32.xlu1 %v2026_v35, %s1344_s22 }
 0x183   : > { %821 = vrot.lane.b32.xlu0 %v2005_v17, %s1344_s22 }
 0x184   : > { %831 = vrot.lane.b32.xlu1 %v2036_v5, %s1344_s22 }
 0x187   : > { %825 = vrot.lane.b32.xlu0 %v2014_v31, %s1344_s22 }
 0x188   : > { %835 = vrot.lane.b32.xlu1 %v2047_v2, %s1344_s22 }
 0x18b   : > { %829 = vrot.lane.b32.xlu0 %v2031_v37, %s1344_s22 }
 0x18c   : > { %882 = vrot.lane.b32.xlu1 %v2021_v20, %s1345_s23 }
 0x18f   : > { %833 = vrot.lane.b32.xlu0 %v2041_v40, %s1344_s22 }
 0x190   : > { %886 = vrot.lane.b32.xlu1 %v2026_v35, %s1345_s23 }
 0x193   : > { %880 = vrot.lane.b32.xlu0 %v2005_v17, %s1345_s23 }
 0x194   : > { %890 = vrot.lane.b32.xlu1 %v2036_v5, %s1345_s23 }
 0x197   : > { %884 = vrot.lane.b32.xlu0 %v2014_v31, %s1345_s23 }
 0x198   : > { %894 = vrot.lane.b32.xlu1 %v2047_v2, %s1345_s23 }
 0x199   : > { %v661_v51 = vpop.permute.xlu1 %660 }
 0x19a   : > { %v684_v61 = vsel %vm609_vm1, %v661_v51, %v1977_v1 }
 0x19b   : > { %888 = vrot.lane.b32.xlu0 %v2031_v37, %s1345_s23 }
 0x19c   : > { %917 = vrot.lane.b32.xlu1 %v2021_v20, %s1346_s24 }
 0x19f   : > { %892 = vrot.lane.b32.xlu0 %v2041_v40, %s1345_s23 }
 0x1a0   : > { %921 = vrot.lane.b32.xlu1 %v2026_v35, %s1346_s24 }
 0x1a3   : > { %915 = vrot.lane.b32.xlu0 %v2005_v17, %s1346_s24  ;;  %v665_v41 = vpop.permute.xlu1 %664 }
 0x1a4   : > { %925 = vrot.lane.b32.xlu1 %v2036_v5, %s1346_s24 }
 0x1a7   : > { %919 = vrot.lane.b32.xlu0 %v2014_v31, %s1346_s24 }
 0x1a8   : > { %929 = vrot.lane.b32.xlu1 %v2047_v2, %s1346_s24 }
 0x1ab   : > { %923 = vrot.lane.b32.xlu0 %v2031_v37, %s1346_s24  ;;  %v663_v54 = vpop.permute.xlu0 %662 }
 0x1ac   : > { %976 = vrot.lane.b32.xlu1 %v2021_v20, %s1347_s25  ;;  %v685_v45 = vsel %vm609_vm1, %v663_v54, %v1979_v49 }
 0x1af   : > { %927 = vrot.lane.b32.xlu0 %v2041_v40, %s1346_s24 }
 0x1b0   : > { %980 = vrot.lane.b32.xlu1 %v2026_v35, %s1347_s25 }
 0x1b1   : > { %v667_v3 = vpop.permute.xlu0 %666 }
 0x1b2   : > { %v687_v18 = vsel %vm609_vm1, %v667_v3, %v1981_v39 }
 0x1b3   : > { %974 = vrot.lane.b32.xlu0 %v2005_v17, %s1347_s25 }
 0x1b4   : > { %984 = vrot.lane.b32.xlu1 %v2036_v5, %s1347_s25 }
 0x1b7   : > { %978 = vrot.lane.b32.xlu0 %v2014_v31, %s1347_s25 }
 0x1b8   : > { %988 = vrot.lane.b32.xlu1 %v2047_v2, %s1347_s25 }
 0x1ba   : > { %v669_v46 = vpop.permute.xlu1 %668 }
 0x1bb   : > { %982 = vrot.lane.b32.xlu0 %v2031_v37, %s1347_s25 }
 0x1bc   : > { %1011 = vrot.lane.b32.xlu1 %v2021_v20, %s1348_s26 }
 0x1bf   : > { %986 = vrot.lane.b32.xlu0 %v2041_v40, %s1347_s25 }
 0x1c0   : > { %1015 = vrot.lane.b32.xlu1 %v2026_v35, %s1348_s26  ;;  %v686_v35 = vsel %vm609_vm1, %v665_v41, %v1983_v38 }
 0x1c1   : > { %v671_v59 = vpop.permute.xlu0 %670 }
 0x1c2   : > { %v689_v56 = vsel %vm609_vm1, %v671_v59, %v1985_v11 }
 0x1c3   : > { %1009 = vrot.lane.b32.xlu0 %v2005_v17, %s1348_s26 }
 0x1c4   : > { %1019 = vrot.lane.b32.xlu1 %v2036_v5, %s1348_s26 }
 0x1c7   : > { %1013 = vrot.lane.b32.xlu0 %v2014_v31, %s1348_s26 }
 0x1c8   : > { %1023 = vrot.lane.b32.xlu1 %v2047_v2, %s1348_s26  ;;  %v688_v2 = vsel %vm609_vm1, %v669_v46, %v1987_v32 }
 0x1ca   : > { %v673_v44 = vpop.permute.xlu1 %672 }
 0x1cb   : > { %1017 = vrot.lane.b32.xlu0 %v2031_v37, %s1348_s26  ;;  %v690_v59 = vsel %vm609_vm1, %v673_v44, %v1991_v43 }
 0x1ce   : > { %v730_v62 = vpop.permute.xlu1 %729 }
 0x1cf   : > { %1021 = vrot.lane.b32.xlu0 %v2041_v40, %s1348_s26  ;;  %v752_v0 = vsel %vm692_vm0, %v730_v62, %v1993_v58 }
 0x1d0   : > { %v760_v48 = vadd.f32 %v752_v0, %v685_v45 }
 0x1d1   : > { %v675_v63 = vpop.permute.xlu0 %674 }
 0x1d2   : > { %v734_v15 = vpop.permute.xlu1 %733  ;;  %v691_v6 = vsel %vm609_vm1, %v675_v63, %v1989_v12  ;;  %v768_v44 = vmul.f32 %v760_v48, %v1469_v7 }
 0x1d3   : > { %v754_v26 = vsel %vm692_vm0, %v734_v15, %v2007_v23 }
 0x1d4   : > { %v762_v57 = vadd.f32 %v754_v26, %v687_v18 }
 0x1d5   : > { %v728_v60 = vpop.permute.xlu0 %727 }
 0x1d6   : > { %v751_v14 = vsel %vm692_vm0, %v728_v60, %v1995_v53  ;;  %v738_v17 = vpop.permute.xlu1 %737  ;;  %v553_v60 = vmul.f32 %v1762_v27, %v1456_v4 }
 0x1d7   : > { %v759_v31 = vadd.f32 %v751_v14, %v684_v61  ;;  %v756_v19 = vsel %vm692_vm0, %v738_v17, %v2010_v9 }
 0x1d8   : > { %v764_v20 = vadd.f32 %v756_v19, %v689_v56 }
 0x1d9   : > { %v732_v24 = vpop.permute.xlu0 %731 }
 0x1da   : > { %v753_v36 = vsel %vm692_vm0, %v732_v24, %v1999_v22  ;;  %v742_v37 = vpop.permute.xlu1 %741  ;;  %v776_v24 = vadd.f32 %v768_v44, %v553_v60  ;;  %v554_v60 = vmul.f32 %v1693_v25, %v1456_v4 }
 0x1db   : > { %v761_v5 = vadd.f32 %v753_v36, %v686_v35  ;;  %v758_v47 = vsel %vm692_vm0, %v742_v37, %v2017_v34  ;;  %v555_v35 = vmul.f32 %v1792_v28, %v1456_v4  ;;  %v770_v36 = vmul.f32 %v762_v57, %v1469_v7 }
 0x1dc   : > { %v766_v40 = vadd.f32 %v758_v47, %v691_v6  ;;  %v767_v28 = vmul.f32 %v759_v31, %v1469_v7  ;;  %v557_v57 = vmul.f32 %v1881_v52, %v1456_v4 }
 0x1dd   : > { %v736_v50 = vpop.permute.xlu0 %735 }
 0x1de   : > { %v755_v51 = vsel %vm692_vm0, %v736_v50, %v1997_v10  ;;  %v789_v41 = vpop.permute.xlu1 %788 }
 0x1df   : > { %v2152_v54 = vadd.f32 %v755_v51, %v688_v2  ;;  %v811_v14 = vsel %vm783_vm2, %v789_v41, %v1979_v49  ;;  %v552_v2 = vmul.f32 %v1604_v30, %v1456_v4  ;;  %v772_v51 = vmul.f32 %v764_v20, %v1469_v7 }
 0x1e1   : > { %v740_v3 = vpop.permute.xlu0 %739 }
 0x1e2   : > { %v757_v62 = vsel %vm692_vm0, %v740_v3, %v2001_v13  ;;  %v793_v45 = vpop.permute.xlu1 %792  ;;  %v778_v3 = vadd.f32 %v770_v36, %v555_v35  ;;  %v774_v35 = vmul.f32 %v766_v40, %v1469_v7 }
 0x1e3   : > { %v2160_v0 = vadd.f32 %v757_v62, %v690_v59  ;;  %v813_v37 = vsel %vm783_vm2, %v793_v45, %v1981_v39 }
 0x1e5   : > { %v787_v46 = vpop.permute.xlu0 %786 }
 0x1e6   : > { %v797_v63 = vpop.permute.xlu1 %796  ;;  %v810_v59 = vsel %vm783_vm2, %v787_v46, %v1977_v1  ;;  %v559_v46 = vmul.f32 %v1934_v8, %v1456_v4 }
 0x1e7   : > { %v815_v31 = vsel %vm783_vm2, %v797_v63, %v1985_v11 }
 0x1e9   : > { %v791_v15 = vpop.permute.xlu0 %790 }
 0x1ea   : > { %v801_v18 = vpop.permute.xlu1 %800  ;;  %v812_v36 = vsel %vm783_vm2, %v791_v15, %v1983_v38 }
 0x1ed   : > { %v795_v26 = vpop.permute.xlu0 %794 }
 0x1ee   : > { %v824_v61 = vpop.permute.xlu1 %823 }
 0x1ef   : > { %v846_v17 = vsel %vm818_vm3, %v824_v61, %v1993_v58 }
 0x1f0   : > { %v854_v56 = vadd.f32 %v846_v17, %v811_v14  ;;  %v775_v14 = vadd.f32 %v767_v28, %v552_v2  ;;  %v780_v17 = vadd.f32 %v772_v51, %v557_v57  ;;  %v556_v2 = vmul.f32 %v1845_v16, %v1456_v4 }
 0x1f1   : > { %v799_v19 = vpop.permute.xlu0 %798  ;;  %v771_v28 = vmul.f32 %v2152_v54, %v1469_v7  ;;  %v782_v51 = vadd.f32 %v774_v35, %v559_v46 }
 0x1f2   : > { %v862_v27 = vmul.f32 %v854_v56, %v1497_v21  ;;  %v828_v48 = vpop.permute.xlu1 %827  ;;  %v769_v56 = vmul.f32 %v761_v5, %v1469_v7  ;;  %v817_v5 = vsel %vm783_vm2, %v801_v18, %v1989_v12 }
 0x1f3   : > { %v848_v6 = vsel %vm818_vm3, %v828_v48, %v2007_v23  ;;  %v779_v54 = vadd.f32 %v771_v28, %v556_v2 }
 0x1f4   : > { %v2183_v47 = vadd.f32 %v862_v27, %v776_v24  ;;  %v856_v50 = vadd.f32 %v848_v6, %v813_v37 }
 0x1f5   : > { %v822_v41 = vpop.permute.xlu0 %821 }
 0x1f6   : > { %v864_v62 = vmul.f32 %v856_v50, %v1497_v21  ;;  %v845_v45 = vsel %vm818_vm3, %v822_v41, %v1995_v53  ;;  %v832_v30 = vpop.permute.xlu1 %831  ;;  %v777_v50 = vadd.f32 %v769_v56, %v554_v60  ;;  %v814_v41 = vsel %vm783_vm2, %v795_v26, %v1987_v32 }
 0x1f7   : > { %v853_v52 = vadd.f32 %v845_v45, %v810_v59  ;;  %v850_v20 = vsel %vm818_vm3, %v832_v30, %v2010_v9  ;;  %v816_v60 = vsel %vm783_vm2, %v799_v19, %v1991_v43 }
 0x1f8   : > { %v2208_v44 = vadd.f32 %v864_v62, %v778_v3  ;;  %v858_v61 = vadd.f32 %v850_v20, %v815_v31  ;;  %v558_v31 = vmul.f32 %v1927_v29, %v1456_v4 }
 0x1f9   : > { %v861_v63 = vmul.f32 %v853_v52, %v1497_v21  ;;  %v826_v24 = vpop.permute.xlu0 %825  ;;  %v773_v52 = vmul.f32 %v2160_v0, %v1469_v7 }
 0x1fa   : > { %v866_v25 = vmul.f32 %v858_v61, %v1497_v21  ;;  %v847_v8 = vsel %vm818_vm3, %v826_v24, %v1999_v22  ;;  %v836_v27 = vpop.permute.xlu1 %835 }
 0x1fb   : > { %v2223_v48 = vadd.f32 %v861_v63, %v775_v14  ;;  %v855_v37 = vadd.f32 %v847_v8, %v812_v36  ;;  %v852_v40 = vsel %vm818_vm3, %v836_v27, %v2017_v34  ;;  %v781_v56 = vadd.f32 %v773_v52, %v558_v31 }
 0x1fc   : > { %v2228_v6 = vadd.f32 %v866_v25, %v780_v17  ;;  %v860_v15 = vadd.f32 %v852_v40, %v817_v5 }
 0x1fd   : > { %v863_v57 = vmul.f32 %v855_v37, %v1497_v21  ;;  %v830_v18 = vpop.permute.xlu0 %829 }
 0x1fe   : > { %v868_v3 = vmul.f32 %v860_v15, %v1497_v21  ;;  %v849_v59 = vsel %vm818_vm3, %v830_v18, %v1997_v10  ;;  %v883_v62 = vpop.permute.xlu1 %882 }
 0x1ff   : > { %v2242_v45 = vadd.f32 %v863_v57, %v777_v50  ;;  %v857_v16 = vadd.f32 %v849_v59, %v814_v41  ;;  %v905_v18 = vsel %vm877_vm5, %v883_v62, %v1979_v49 }
 0x200   : > { %v2244_v30 = vadd.f32 %v868_v3, %v782_v51 }
 0x201   : > { %v865_v26 = vmul.f32 %v857_v16, %v1497_v21  ;;  %v834_v20 = vpop.permute.xlu0 %833 }
 0x202   : > { %v851_v46 = vsel %vm818_vm3, %v834_v20, %v2001_v13  ;;  %v887_v61 = vpop.permute.xlu1 %886 }
 0x203   : > { %v2257_v14 = vadd.f32 %v865_v26, %v779_v54  ;;  %v859_v17 = vadd.f32 %v851_v46, %v816_v60  ;;  %v907_v16 = vsel %vm877_vm5, %v887_v61, %v1981_v39 }
 0x205   : > { %v867_v4 = vmul.f32 %v859_v17, %v1497_v21  ;;  %v881_v29 = vpop.permute.xlu0 %880 }
 0x206   : > { %v891_v7 = vpop.permute.xlu1 %890  ;;  %v904_v60 = vsel %vm877_vm5, %v881_v29, %v1977_v1 }
 0x207   : > { %v2260_v0 = vadd.f32 %v867_v4, %v781_v56  ;;  %v909_v46 = vsel %vm877_vm5, %v891_v7, %v1985_v11 }
 0x209   : > { %v885_v63 = vpop.permute.xlu0 %884 }
 0x20a   : > { %v895_v24 = vpop.permute.xlu1 %894 }
 0x20d   : > { %v2262_v35 = vpop.permute.xlu0 %888 }
 0x20e   : > { %v918_v19 = vpop.permute.xlu1 %917 }
 0x20f   : > { %v940_v57 = vsel %vm912_vm4, %v918_v19, %v1993_v58 }
 0x210   : > { %v948_v41 = vadd.f32 %v940_v57, %v905_v18  ;;  %v911_v57 = vsel %vm877_vm5, %v895_v24, %v1989_v12 }
 0x211   : > { %v2264_v36 = vpop.permute.xlu0 %892 }
 0x212   : > { %v922_v25 = vpop.permute.xlu1 %921  ;;  %v956_v26 = vmul.f32 %v948_v41, %v1532_v33 }
 0x213   : > { %v942_v3 = vsel %vm912_vm4, %v922_v25, %v2007_v23 }
 0x214   : > { %v950_v54 = vadd.f32 %v942_v3, %v907_v16  ;;  %v964_v7 = vadd.f32 %v956_v26, %v2183_v47 }
 0x215   : > { %v916_v8 = vpop.permute.xlu0 %915 }
 0x216   : > { %v926_v27 = vpop.permute.xlu1 %925  ;;  %v939_v62 = vsel %vm912_vm4, %v916_v8, %v1995_v53  ;;  %v958_v25 = vmul.f32 %v950_v54, %v1532_v33 }
 0x217   : > { %v944_v31 = vsel %vm912_vm4, %v926_v27, %v2010_v9  ;;  %v947_v56 = vadd.f32 %v939_v62, %v904_v60 }
 0x218   : > { %v952_v4 = vadd.f32 %v944_v31, %v909_v46 }
 0x219   : > { %v920_v5 = vpop.permute.xlu0 %919 }
 0x21a   : > { %v930_v37 = vpop.permute.xlu1 %929  ;;  %v960_v18 = vmul.f32 %v952_v4, %v1532_v33 }
 0x21d   : > { %v924_v40 = vpop.permute.xlu0 %923 }
 0x21e   : > { %v977_v15 = vpop.permute.xlu1 %976  ;;  %v943_v24 = vsel %vm912_vm4, %v924_v40, %v1997_v10  ;;  %v908_v40 = vsel %vm877_vm5, %v2262_v35, %v1987_v32 }
 0x21f   : > { %v999_v61 = vsel %vm971_vm6, %v977_v15, %v1979_v49  ;;  %v941_v49 = vsel %vm912_vm4, %v920_v5, %v1999_v22  ;;  %v906_v15 = vsel %vm877_vm5, %v885_v63, %v1983_v38  ;;  %v966_v63 = vadd.f32 %v958_v25, %v2208_v44 }
 0x220   : > { %v949_v16 = vadd.f32 %v941_v49, %v906_v15  ;;  %v951_v35 = vadd.f32 %v943_v24, %v908_v40 }
 0x221   : > { %v2266_v50 = vpop.permute.xlu0 %927 }
 0x222   : > { %v981_v21 = vpop.permute.xlu1 %980  ;;  %v957_v46 = vmul.f32 %v949_v16, %v1532_v33  ;;  %v959_v49 = vmul.f32 %v951_v35, %v1532_v33 }
 0x223   : > { %v1001_v47 = vsel %vm971_vm6, %v981_v21, %v1981_v39 }
 0x225   : > { %v975_v2 = vpop.permute.xlu0 %974 }
 0x226   : > { %v985_v28 = vpop.permute.xlu1 %984  ;;  %v998_v39 = vsel %vm971_vm6, %v975_v2, %v1977_v1 }
 0x227   : > { %v1003_v1 = vsel %vm971_vm6, %v985_v28, %v1985_v11  ;;  %v945_v11 = vsel %vm912_vm4, %v2266_v50, %v2001_v13 }
 0x229   : > { %v2276_v51 = vpop.permute.xlu0 %978 }
 0x22a   : > { %v2281_v59 = vpop.permute.xlu1 %988 }
 0x22b   : > { %v1005_v50 = vsel %vm971_vm6, %v2281_v59, %v1989_v12 }
 0x22d   : > { %v2294_v52 = vpop.permute.xlu0 %982 }
 0x22e   : > { %v1012_v20 = vpop.permute.xlu1 %1011 }
 0x22f   : > { %v1034_v17 = vsel %vm1006_vm7, %v1012_v20, %v1993_v58  ;;  %v946_v58 = vsel %vm912_vm4, %v930_v37, %v2017_v34  ;;  %v955_v37 = vmul.f32 %v947_v56, %v1532_v33 }
 0x230   : > { %v1042_v19 = vadd.f32 %v1034_v17, %v999_v61  ;;  %v954_v54 = vadd.f32 %v946_v58, %v911_v57 }
 0x231   : > { %v2313_v29 = vpop.permute.xlu0 %986  ;;  %v963_v26 = vadd.f32 %v955_v37, %v2223_v48 }
 0x232   : > { %v1050_v8 = vmul.f32 %v1042_v19, %v1552_v42  ;;  %v1016_v27 = vpop.permute.xlu1 %1015  ;;  %v962_v61 = vmul.f32 %v954_v54, %v1532_v33 }
 0x233   : > { %v1036_v5 = vsel %vm1006_vm7, %v1016_v27, %v2007_v23 }
 0x234   : > { %v1058_v41 = vadd.f32 %v1050_v8, %v964_v7  ;;  %v1044_v3 = vadd.f32 %v1036_v5, %v1001_v47  ;;  %v965_v7 = vadd.f32 %v957_v46, %v2242_v45 }
 0x235   : > { %v1010_v62 = vpop.permute.xlu0 %1009 }
 0x236   : > { %1067 = vst.msk [vmem:[%s2344_s29 + $0x8] sm:$0xff] %vm1065_vm8, %v1058_v41  ;;  %v1052_v23 = vmul.f32 %v1044_v3, %v1552_v42  ;;  %v1033_v44 = vsel %vm1006_vm7, %v1010_v62, %v1995_v53  ;;  %v1020_v21 = vpop.permute.xlu1 %1019  ;;  %v968_v53 = vadd.f32 %v960_v18, %v2228_v6 }
 0x237   : > { %v1041_v2 = vadd.f32 %v1033_v44, %v998_v39  ;;  %v1038_v31 = vsel %vm1006_vm7, %v1020_v21, %v2010_v9  ;;  %v1000_v9 = vsel %vm971_vm6, %v2276_v51, %v1983_v38  ;;  %v910_v51 = vsel %vm877_vm5, %v2264_v36, %v1991_v43 }
 0x238   : > { %v1060_v20 = vadd.f32 %v1052_v23, %v966_v63  ;;  %v1046_v60 = vadd.f32 %v1038_v31, %v1003_v1  ;;  %v953_v58 = vadd.f32 %v945_v11, %v910_v51  ;;  %v1002_v36 = vsel %vm971_vm6, %v2294_v52, %v1987_v32 }
 0x239   : > { %v1049_v17 = vmul.f32 %v1041_v2, %v1552_v42  ;;  %v1014_v56 = vpop.permute.xlu0 %1013 }
 0x23a   : > { %1069 = vst.msk [vmem:[%s2344_s29 + $0x18] sm:$0xff] %vm1065_vm8, %v1060_v20  ;;  %v1054_v48 = vmul.f32 %v1046_v60, %v1552_v42  ;;  %v1035_v6 = vsel %vm1006_vm7, %v1014_v56, %v1999_v22  ;;  %v1024_v28 = vpop.permute.xlu1 %1023  ;;  %v961_v47 = vmul.f32 %v953_v58, %v1532_v33 }
 0x23b   : > { %v1057_v4 = vadd.f32 %v1049_v17, %v963_v26  ;;  %v1043_v19 = vadd.f32 %v1035_v6, %v1000_v9  ;;  %v1040_v38 = vsel %vm1006_vm7, %v1024_v28, %v2017_v34  ;;  %v970_v34 = vadd.f32 %v962_v61, %v2244_v30 }
 0x23c   : > { %v1062_v25 = vadd.f32 %v1054_v48, %v968_v53  ;;  %v1048_v22 = vadd.f32 %v1040_v38, %v1005_v50  ;;  %v967_v30 = vadd.f32 %v959_v49, %v2257_v14  ;;  %v969_v37 = vadd.f32 %v961_v47, %v2260_v0 }
 0x23d   : > { %1066 = vst.msk [vmem:[%s2344_s29] sm:$0xff] %vm1065_vm8, %v1057_v4  ;;  %v1051_v12 = vmul.f32 %v1043_v19, %v1552_v42  ;;  %v1018_v59 = vpop.permute.xlu0 %1017 }
 0x23e   : > { %1071 = vst.msk [vmem:[%s2344_s29 + $0x28] sm:$0xff] %vm1065_vm8, %v1062_v25  ;;  %v1056_v45 = vmul.f32 %v1048_v22, %v1552_v42  ;;  %v1037_v8 = vsel %vm1006_vm7, %v1018_v59, %v1997_v10  ;;  %v1004_v10 = vsel %vm971_vm6, %v2313_v29, %v1991_v43 }
 0x23f   : > { %v1059_v27 = vadd.f32 %v1051_v12, %v965_v7  ;;  %v1045_v15 = vadd.f32 %v1037_v8, %v1002_v36 }
 0x240   : > { %v1064_v57 = vadd.f32 %v1056_v45, %v970_v34 }
 0x241   : > { %1068 = vst.msk [vmem:[%s2344_s29 + $0x10] sm:$0xff] %vm1065_vm8, %v1059_v27  ;;  %v1053_v32 = vmul.f32 %v1045_v15, %v1552_v42  ;;  %v1022_v52 = vpop.permute.xlu0 %1021 }
 0x242   : > { %1073 = vst.msk [vmem:[%s2344_s29 + $0x38] sm:$0xff] %vm1065_vm8, %v1064_v57  ;;  %v1039_v14 = vsel %vm1006_vm7, %v1022_v52, %v2001_v13 }
 0x243   : > { %v1061_v33 = vadd.f32 %v1053_v32, %v967_v30  ;;  %v1047_v5 = vadd.f32 %v1039_v14, %v1004_v10 }
 0x245   : > { %1070 = vst.msk [vmem:[%s2344_s29 + $0x20] sm:$0xff] %vm1065_vm8, %v1061_v33  ;;  %v1055_v18 = vmul.f32 %v1047_v5, %v1552_v42 }
 0x247   : > { %v1063_v43 = vadd.f32 %v1055_v18, %v969_v37 }
 0x249   : > { %1072 = vst.msk [vmem:[%s2344_s29 + $0x30] sm:$0xff] %vm1065_vm8, %v1063_v43 }
 0x24a   : > { %1282 = shalt.err (!%p1279_p2)
}
 0x24b   : > { %s1283_s17 = scalar_lea.hbm %s2431_s6, 1024  ;;  %s1287_s23 = scalar_lea.hbm %s2482_s2, 2048 }
 0x24c   : > { %p1284_p3 = scmp.ne.s32.totalorder %s2431_s6, %s1283_s17  ;;  %p1288_p8 = scmp.lt.u32.totalorder %s2431_s6, %s2482_s2 }
 0x24d   : > { %p1289_p11 = scmp.lt.u32.totalorder %s1287_s23, %s1283_s17  ;;  %p1291_p10 = scmp.lt.u32.totalorder %s1283_s17, %s2431_s6 }
 0x24e   : > { %p1285_p4 = pnand %p1284_p3, %p1405_p5 }
 0x24f   : > { %p1290_p9 = por %p1289_p11, %p1288_p8 }
 0x250   : > { %p1286_p7 = pneg %p1285_p4 }
 0x251   : > { %p1292_p12 = por %p1291_p10, %p1290_p9 }
 0x253   : > { %p1293_p13 = pnand %p1292_p12, %p1286_p7 }
 0x255   : > { %1296 = shalt.err (!%p1293_p13)
}
 0x256   : > { %s1350_s26 = smov 128   ;;  %s1351_s27 = smov 8  }
 0x257   : > { %1191 = dma.vmem_to_hbm [thread:$0]  (%p1405_p5), %s2433_s3, 1024, %s2431_s6, %s2439_s13, %s1350_s26, %s1350_s26, %s1351_s27  }
 0x258 PF: > { %p1203_p0 = scmp.ge.s32.totalorder %s1335_s12, 2  ;;  %s1104_s28 = sand.u32 1, %s1323_s9  }
 0x259   : > { %s1105_s29 = scalar_lea.sflag [#allocation3], %s1104_s28 }
 0x25a   : > { %p1198_p1 = pnand %p1203_p0, %p1409_p6 }
 0x25c   : > { %1318 = dma.done.wait (!%p1198_p1), %s1105_s29, 1024  }
 0x25d   : > { %1320 = vsyncadd (!%p1198_p1), %s1105_s29, 4294966272  ;;  %p13_p2 = scmp.ge.s32.totalorder %s1392_s15, 4   ;;  %s2486_s9 = smov %s1327_s10 }
 0x25e   : > { %s2487_s10 = smov %s1331_s11  ;;  %s2488_s11 = smov %s1403_s18 }
 0x25f   : > { %s2489_s12 = smov %s1392_s15  ;;  %15 = sbr.rel (!%p13_p2) target bundleno = 4 (0x4), region = 68 }
 0x266   :  { %1110 = vsyncpa [#allocation3], 1 }
 0x267   :  { %1112 = vsyncpa [#allocation3 + $0x1], 1 }
 0x268   :  { %1113 = vsyncpa [#allocation4], 1 }
 0x269   :  { %1115 = vsyncpa [#allocation4 + $0x1], 1 }

</bundles_post_ra>
